<compile_context>
chip_gen: v7x
topology: tpu7x:2x2x1
jax: 0.10.0
libtpu: 0.0.40
codegen_flags: <defaults>
</compile_context>

<pallas_src>
import functools

import jax
import jax.numpy as jnp
from jax.experimental import pallas as pl
from jax.experimental.pallas import tpu as pltpu

EPS = 1e-5          # nn.BatchNorm2d default eps
CH_TILE = 16        # bf16 sublane tile -> every channel dim padded to this


def _rup(x, m):
    return (x + m - 1) // m * m


# ---------------------------------------------------------------- kernel -----
def _fused_unet_up_kernel(xup_ref, br_ref, mask_ref,
                          wtA_ref, bt_ref,
                          w1s_ref, b1_ref, g1_ref, be1_ref,
                          w2s_ref, b2_ref, g2_ref, be2_ref,
                          o_ref,
                          upf_ref, z1f_ref, stkA_ref, stkB_ref, stkC_ref,
                          *, Wp, PADL, LcPad, C2p, CH, CB, inv_count):
    """Whole UnetUpBlock forward on one VMEM-resident tile.

    Core column j of every (C, LcPad) operand corresponds to the flattened,
    zero-padded spatial position (Wp+1) + j  (= n*Hp*Wp + r*Wp + c).  A conv
    tap (dh, dw) is then a constant flat shift; borders / zero-stuffed / pad
    positions are killed by a precomputed validity mask.
    """
    f32 = jnp.float32
    bf16 = jnp.bfloat16
    CCAT = CH + CB
    SpPad = upf_ref.shape[1]
    PADR = SpPad - PADL - LcPad

    # hoisted validity mask (1.0 on real output pixels, 0.0 elsewhere)
    maskb = jnp.broadcast_to(mask_ref[...], (CH, LcPad))

    taps2 = [(p, q) for p in range(2) for q in range(2)]
    taps3 = [(dh, dw) for dh in range(3) for dw in range(3)]

    # ---- stage A: ConvTranspose2d(k=2, s=2) ----------------------------------
    # 4 taps of the zero-stuffed input stacked along K -> one matmul.
    for t, (p, q) in enumerate(taps2):
        s = PADL - p * Wp - q
        stkA_ref[t * C2p:(t + 1) * C2p, :] = xup_ref[:, s:s + LcPad]
    up = jnp.dot(wtA_ref[...], stkA_ref[...], preferred_element_type=f32)
    up = (up + bt_ref[...]) * maskb                  # bias only on valid pixels

    # padded flat scratch: zero only the (aligned) borders, overwrite the core
    upf_ref[:, 0:PADL] = jnp.zeros((CH, PADL), bf16)
    upf_ref[:, PADL + LcPad:SpPad] = jnp.zeros((CH, PADR), bf16)
    upf_ref[:, PADL:PADL + LcPad] = up.astype(bf16)

    # ---- stage B: Conv3x3(concat(up, bridge)) + bias + ReLU + BatchNorm ------
    # torch.cat(dim=1) is realized by interleaving up-rows / bridge-rows per
    # tap inside the stacked operand; one matmul with K = 9*(CH+CB).
    for t, (dh, dw) in enumerate(taps3):
        s = PADL + (dh - 1) * Wp + (dw - 1)
        stkB_ref[t * CCAT:t * CCAT + CH, :] = upf_ref[:, s:s + LcPad]
        stkB_ref[t * CCAT + CH:(t + 1) * CCAT, :] = br_ref[:, s:s + LcPad]
    acc1 = jnp.dot(w1s_ref[...], stkB_ref[...], preferred_element_type=f32)
    y1 = jnp.maximum(acc1 + b1_ref[...], 0.0) * maskb       # ReLU, borders -> 0
    m1 = jnp.sum(y1, axis=1, keepdims=True) * inv_count
    e1 = jnp.sum(y1 * y1, axis=1, keepdims=True) * inv_count
    a1 = g1_ref[...] * jax.lax.rsqrt(e1 - m1 * m1 + EPS)
    z1 = (a1 * (y1 - m1) + be1_ref[...]) * maskb

    z1f_ref[:, 0:PADL] = jnp.zeros((CH, PADL), bf16)
    z1f_ref[:, PADL + LcPad:SpPad] = jnp.zeros((CH, PADR), bf16)
    z1f_ref[:, PADL:PADL + LcPad] = z1.astype(bf16)

    # ---- stage C: Conv3x3 + bias + ReLU + BatchNorm ---------------------------
    for t, (dh, dw) in enumerate(taps3):
        s = PADL + (dh - 1) * Wp + (dw - 1)
        stkC_ref[t * CH:(t + 1) * CH, :] = z1f_ref[:, s:s + LcPad]
    acc2 = jnp.dot(w2s_ref[...], stkC_ref[...], preferred_element_type=f32)
    y2 = jnp.maximum(acc2 + b2_ref[...], 0.0) * maskb
    m2 = jnp.sum(y2, axis=1, keepdims=True) * inv_count
    e2 = jnp.sum(y2 * y2, axis=1, keepdims=True) * inv_count
    a2 = g2_ref[...] * jax.lax.rsqrt(e2 - m2 * m2 + EPS)
    o_ref[...] = (a2 * (y2 - m2) + be2_ref[...]) * maskb     # masked output


def _full_block(shape):
    nd = len(shape)
    return pl.BlockSpec(shape, lambda i, _nd=nd: (0,) * _nd)


# --------------------------------------------------------------- wrapper -----
@jax.jit
def unet_up_block(x_nchw, bridge_nchw, p):
    """UnetUpBlock forward (training-mode BatchNorm).  NCHW in / NCHW out."""
    f32, bf16 = jnp.float32, jnp.bfloat16

    N, C2, H, W = x_nchw.shape
    Cb = bridge_nchw.shape[1]
    Ct = p["wt"].shape[1]                 # ConvTranspose output channels
    Cout = p["w1"].shape[0]
    assert Ct == Cout                     # both are `out_channels` in the module
    Ho, Wo = 2 * H, 2 * W
    Hp, Wp = Ho + 2, Wo + 2               # +1 zero border around each image
    Sp = N * Hp * Wp                      # flattened padded spatial extent
    C0 = Wp + 1                           # first "core" flat position
    Lc = Sp - 2 * C0                      # minimal core width (covers every px)

    # lane-dense / aligned geometry
    LcPad = _rup(Lc, 128)                 # core width rounded up to 128
    PADL = _rup(C0, 128)                  # left border >= max tap shift, aligned
    SpPad = PADL + LcPad + PADL           # right border == left border
    padL = PADL - C0
    padR = SpPad - padL - Sp

    C2p = _rup(C2, CH_TILE)
    CH = _rup(Cout, CH_TILE)              # padded Ct == padded Cout
    CB = _rup(Cb, CH_TILE)
    CCAT = CH + CB

    # ---- zero-stuffed (stride-2) input, channel-major, padded, flattened -----
    x_cm = jnp.transpose(x_nchw, (1, 0, 2, 3))                      # (C2,N,H,W)
    xup = jnp.zeros((C2p, N, Hp, Wp), f32)
    xup = xup.at[:C2, :, 1:1 + Ho:2, 1:1 + Wo:2].set(x_cm)
    xup = jnp.pad(xup.reshape(C2p, Sp), ((0, 0), (padL, padR))).astype(bf16)

    # bridge, channel-major, zero-padded, flattened
    br = jnp.zeros((CB, N, Hp, Wp), f32)
    br = br.at[:Cb, :, 1:1 + Ho, 1:1 + Wo].set(
        jnp.transpose(bridge_nchw, (1, 0, 2, 3)))
    br = jnp.pad(br.reshape(CB, Sp), ((0, 0), (padL, padR))).astype(bf16)

    # validity mask over the (padded) core columns
    m = jnp.zeros((1, N, Hp, Wp), f32)
    m = m.at[:, :, 1:1 + Ho, 1:1 + Wo].set(1.0)
    m = jnp.pad(m.reshape(1, Sp), ((0, 0), (padL, padR)))
    mask = m[:, PADL:PADL + LcPad]

    # ---- stacked per-tap weights (C_out x K), lane-dense matmul LHS ----------
    wt = p["wt"]                                        # (C2, Ct, 2, 2)
    wtA = jnp.zeros((CH, 4, C2p), f32)
    for t, (a, b) in enumerate([(pp, qq) for pp in range(2) for qq in range(2)]):
        wtA = wtA.at[:Ct, t, :C2].set(wt[:, :, a, b].T)
    wtA = wtA.reshape(CH, 4 * C2p).astype(bf16)

    w1 = p["w1"]                                        # (Cout, C2, 3, 3)
    w2 = p["w2"]                                        # (Cout, Cout, 3, 3)
    w1s = jnp.zeros((CH, 9, CCAT), f32)
    w2s = jnp.zeros((CH, 9, CH), f32)
    for t, (a, b) in enumerate([(dh, dw) for dh in range(3) for dw in range(3)]):
        w1s = w1s.at[:Cout, t, :Ct].set(w1[:, :Ct, a, b])          # 'up' rows
        w1s = w1s.at[:Cout, t, CH:CH + Cb].set(w1[:, Ct:, a, b])   # bridge rows
        w2s = w2s.at[:Cout, t, :Cout].set(w2[:, :, a, b])
    w1s = w1s.reshape(CH, 9 * CCAT).astype(bf16)
    w2s = w2s.reshape(CH, 9 * CH).astype(bf16)

    def colp(v):                                        # (CH,1) f32, zero-padded
        return jnp.zeros((CH, 1), f32).at[:v.shape[0], 0].set(v)

    bt, b1, g1, be1 = colp(p["bt"]), colp(p["b1"]), colp(p["g1"]), colp(p["be1"])
    b2, g2, be2 = colp(p["b2"]), colp(p["g2"]), colp(p["be2"])

    args = (xup, br, mask, wtA, bt, w1s, b1, g1, be1, w2s, b2, g2, be2)

    kernel = functools.partial(
        _fused_unet_up_kernel,
        Wp=Wp, PADL=PADL, LcPad=LcPad, C2p=C2p, CH=CH, CB=CB,
        inv_count=1.0 / float(N * Ho * Wo))

    out_core = pl.pallas_call(
        kernel,
        out_shape=jax.ShapeDtypeStruct((CH, LcPad), f32),
        grid=(1,),
        in_specs=[_full_block(a.shape) for a in args],
        out_specs=pl.BlockSpec((CH, LcPad), lambda i: (0, 0)),
        scratch_shapes=[pltpu.VMEM((CH, SpPad), bf16),         # padded 'up'
                        pltpu.VMEM((CH, SpPad), bf16),         # padded conv1 out
                        pltpu.VMEM((4 * C2p, LcPad), bf16),    # stacked stage A
                        pltpu.VMEM((9 * CCAT, LcPad), bf16),   # stacked stage B
                        pltpu.VMEM((9 * CH, LcPad), bf16)],    # stacked stage C
        compiler_params=pltpu.CompilerParams(
            dimension_semantics=("arbitrary",),
            # tiny footprint here; re-derive per generation once spatially tiled
            vmem_limit_bytes=32 * 1024 * 1024),
    )(*args)

    # core column j <-> flat padded position (Wp+1)+j: reshape WITHOUT the +C0
    # offset (off-by-one-row-and-column trick), then drop the trailing pad.
    if LcPad >= Sp:
        out_flat = out_core[:, :Sp]
    else:
        out_flat = jnp.pad(out_core, ((0, 0), (0, Sp - LcPad)))
    out = out_flat.reshape(CH, N, Hp, Wp)[:Cout, :, :Ho, :Wo]
    return jnp.transpose(out, (1, 0, 2, 3))             # back to NCHW


# -------------------------------------------------------- pure-JAX reference -
def reference(x, bridge, p):
    up = jnp.einsum("nchw,codk->nohwdk", x, p["wt"])
    N, O, H, W, _, _ = up.shape
    up = up.transpose(0, 1, 2, 4, 3, 5).reshape(N, O, 2 * H, 2 * W)
    up = up + p["bt"][None, :, None, None]
    cat = jnp.concatenate([up, bridge], axis=1)

    def block(z, w, b, g, be):
        y = jax.lax.conv_general_dilated(
            z, w, (1, 1), ((1, 1), (1, 1)),
            dimension_numbers=("NCHW", "OIHW", "NCHW")) + b[None, :, None, None]
        y = jnp.maximum(y, 0.0)
        mean = y.mean(axis=(0, 2, 3), keepdims=True)
        var = ((y - mean) ** 2).mean(axis=(0, 2, 3), keepdims=True)
        return (g[None, :, None, None] * (y - mean) / jnp.sqrt(var + EPS)
                + be[None, :, None, None])

    h = block(cat, p["w1"], p["b1"], p["g1"], p["be1"])
    h = block(h, p["w2"], p["b2"], p["g2"], p["be2"])
    return h


# ------------------------------------------------------------------- main ----
if __name__ == "__main__":
    in_channels, out_channels = 4, 4
    C2 = in_channels * 2          # = 8 (channels of x and of the concat input)
    N, H, W = 2, 8, 8             # x spatial; bridge is 2H x 2W

    key = jax.random.PRNGKey(0)
    ks = jax.random.split(key, 12)
    f32 = jnp.float32
    params = {
        # ConvTranspose2d(C2, out_channels, 2, stride=2): weight (C2, Cout, 2, 2)
        "wt": 0.1 * jax.random.normal(ks[0], (C2, out_channels, 2, 2), f32),
        "bt": 0.1 * jax.random.normal(ks[1], (out_channels,), f32),
        # Conv2d(C2, out_channels, 3, padding=1): weight (Cout, C2, 3, 3)
        "w1": 0.1 * jax.random.normal(ks[2], (out_channels, C2, 3, 3), f32),
        "b1": 0.1 * jax.random.normal(ks[3], (out_channels,), f32),
        "g1": 1.0 + 0.1 * jax.random.normal(ks[4], (out_channels,), f32),
        "be1": 0.1 * jax.random.normal(ks[5], (out_channels,), f32),
        # Conv2d(out_channels, out_channels, 3, padding=1)
        "w2": 0.1 * jax.random.normal(ks[6], (out_channels, out_channels, 3, 3), f32),
        "b2": 0.1 * jax.random.normal(ks[7], (out_channels,), f32),
        "g2": 1.0 + 0.1 * jax.random.normal(ks[8], (out_channels,), f32),
        "be2": 0.1 * jax.random.normal(ks[9], (out_channels,), f32),
    }

    x = jax.random.normal(ks[10], (N, C2, H, W), f32)                  # NCHW
    x_bridge = jax.random.normal(ks[11], (N, in_channels, 2 * H, 2 * W), f32)

    out = jax.block_until_ready(unet_up_block(x, x_bridge, params))
    ref = jax.block_until_ready(reference(x, x_bridge, params))

    assert out.shape == (N, out_channels, 2 * H, 2 * W), out.shape
    # bf16 MXU operands (f32 accumulation) -> slightly looser tolerance than f32.
    assert jnp.allclose(out, ref, atol=5e-2, rtol=5e-2), \
        float(jnp.abs(out - ref).max())

    print("KERNEL_OK")
</pallas_src>

<mosaic_0001>
module attributes {stable_mosaic.version = 11 : i64} {
  func.func @_fused_unet_up_kernel(%arg0: i32, %arg1: memref<16x896xbf16, #tpu.memory_space<vmem>>, %arg2: memref<16x896xbf16, #tpu.memory_space<vmem>>, %arg3: memref<1x640xf32, #tpu.memory_space<vmem>>, %arg4: memref<16x64xbf16, #tpu.memory_space<vmem>>, %arg5: memref<16x1xf32, #tpu.memory_space<vmem>>, %arg6: memref<16x288xbf16, #tpu.memory_space<vmem>>, %arg7: memref<16x1xf32, #tpu.memory_space<vmem>>, %arg8: memref<16x1xf32, #tpu.memory_space<vmem>>, %arg9: memref<16x1xf32, #tpu.memory_space<vmem>>, %arg10: memref<16x144xbf16, #tpu.memory_space<vmem>>, %arg11: memref<16x1xf32, #tpu.memory_space<vmem>>, %arg12: memref<16x1xf32, #tpu.memory_space<vmem>>, %arg13: memref<16x1xf32, #tpu.memory_space<vmem>>, %arg14: memref<16x640xf32, #tpu.memory_space<vmem>>, %arg15: memref<16x896xbf16, #tpu.memory_space<vmem>>, %arg16: memref<16x896xbf16, #tpu.memory_space<vmem>>, %arg17: memref<64x640xbf16, #tpu.memory_space<vmem>>, %arg18: memref<288x640xbf16, #tpu.memory_space<vmem>>, %arg19: memref<144x640xbf16, #tpu.memory_space<vmem>>) attributes {dimension_semantics = [#tpu.dimension_semantics<arbitrary>], iteration_bounds = array<i64: 1>, scalar_prefetch = 0 : i64, scratch_operands = 5 : i64, tpu.core_type = #tpu.core_type<tc>, window_params = [{pipeline_mode = #tpu.pipeline_mode<synchronous>, transform_indices = @transform_0, window_bounds = array<i64: 16, 896>}, {pipeline_mode = #tpu.pipeline_mode<synchronous>, transform_indices = @transform_1, window_bounds = array<i64: 16, 896>}, {pipeline_mode = #tpu.pipeline_mode<synchronous>, transform_indices = @transform_2, window_bounds = array<i64: 1, 640>}, {pipeline_mode = #tpu.pipeline_mode<synchronous>, transform_indices = @transform_3, window_bounds = array<i64: 16, 64>}, {pipeline_mode = #tpu.pipeline_mode<synchronous>, transform_indices = @transform_4, window_bounds = array<i64: 16, 1>}, {pipeline_mode = #tpu.pipeline_mode<synchronous>, transform_indices = @transform_5, window_bounds = array<i64: 16, 288>}, {pipeline_mode = #tpu.pipeline_mode<synchronous>, transform_indices = @transform_6, window_bounds = array<i64: 16, 1>}, {pipeline_mode = #tpu.pipeline_mode<synchronous>, transform_indices = @transform_7, window_bounds = array<i64: 16, 1>}, {pipeline_mode = #tpu.pipeline_mode<synchronous>, transform_indices = @transform_8, window_bounds = array<i64: 16, 1>}, {pipeline_mode = #tpu.pipeline_mode<synchronous>, transform_indices = @transform_9, window_bounds = array<i64: 16, 144>}, {pipeline_mode = #tpu.pipeline_mode<synchronous>, transform_indices = @transform_10, window_bounds = array<i64: 16, 1>}, {pipeline_mode = #tpu.pipeline_mode<synchronous>, transform_indices = @transform_11, window_bounds = array<i64: 16, 1>}, {pipeline_mode = #tpu.pipeline_mode<synchronous>, transform_indices = @transform_12, window_bounds = array<i64: 16, 1>}, {pipeline_mode = #tpu.pipeline_mode<synchronous>, transform_indices = @transform_13, window_bounds = array<i64: 16, 640>}]} {
    %c0 = arith.constant 0 : index
    %c0_0 = arith.constant 0 : index
    %0 = vector.load %arg3[%c0, %c0_0] : memref<1x640xf32, #tpu.memory_space<vmem>>, vector<1x640xf32>
    %1 = vector.shape_cast %0 : vector<1x640xf32> to vector<1x640xf32>
    %2 = vector.broadcast %1 : vector<1x640xf32> to vector<16x640xf32>
    %c0_1 = arith.constant 0 : index
    %c128 = arith.constant 128 : index
    %3 = vector.load %arg1[%c0_1, %c128] : memref<16x896xbf16, #tpu.memory_space<vmem>>, vector<16x640xbf16>
    %c0_2 = arith.constant 0 : index
    %c0_3 = arith.constant 0 : index
    %4 = vector.load %arg17[%c0_2, %c0_3] : memref<64x640xbf16, #tpu.memory_space<vmem>>, vector<16x640xbf16>
    tpu.vector_store %arg17[%c0_2, %c0_3], %3 {strides = array<i32>} : memref<64x640xbf16, #tpu.memory_space<vmem>>, vector<16x640xbf16>,
    %c0_4 = arith.constant 0 : index
    %c127 = arith.constant 127 : index
    %5 = vector.load %arg1[%c0_4, %c127] : memref<16x896xbf16, #tpu.memory_space<vmem>>, vector<16x640xbf16>
    %c16 = arith.constant 16 : index
    %c0_5 = arith.constant 0 : index
    %6 = vector.load %arg17[%c16, %c0_5] : memref<64x640xbf16, #tpu.memory_space<vmem>>, vector<16x640xbf16>
    tpu.vector_store %arg17[%c16, %c0_5], %5 {strides = array<i32>} : memref<64x640xbf16, #tpu.memory_space<vmem>>, vector<16x640xbf16>,
    %c0_6 = arith.constant 0 : index
    %c110 = arith.constant 110 : index
    %7 = vector.load %arg1[%c0_6, %c110] : memref<16x896xbf16, #tpu.memory_space<vmem>>, vector<16x640xbf16>
    %c32 = arith.constant 32 : index
    %c0_7 = arith.constant 0 : index
    %8 = vector.load %arg17[%c32, %c0_7] : memref<64x640xbf16, #tpu.memory_space<vmem>>, vector<16x640xbf16>
    tpu.vector_store %arg17[%c32, %c0_7], %7 {strides = array<i32>} : memref<64x640xbf16, #tpu.memory_space<vmem>>, vector<16x640xbf16>,
    %c0_8 = arith.constant 0 : index
    %c109 = arith.constant 109 : index
    %9 = vector.load %arg1[%c0_8, %c109] : memref<16x896xbf16, #tpu.memory_space<vmem>>, vector<16x640xbf16>
    %c48 = arith.constant 48 : index
    %c0_9 = arith.constant 0 : index
    %10 = vector.load %arg17[%c48, %c0_9] : memref<64x640xbf16, #tpu.memory_space<vmem>>, vector<16x640xbf16>
    tpu.vector_store %arg17[%c48, %c0_9], %9 {strides = array<i32>} : memref<64x640xbf16, #tpu.memory_space<vmem>>, vector<16x640xbf16>,
    %c0_10 = arith.constant 0 : index
    %c0_11 = arith.constant 0 : index
    %11 = vector.load %arg4[%c0_10, %c0_11] : memref<16x64xbf16, #tpu.memory_space<vmem>>, vector<16x64xbf16>
    %c0_12 = arith.constant 0 : index
    %c0_13 = arith.constant 0 : index
    %12 = vector.load %arg17[%c0_12, %c0_13] : memref<64x640xbf16, #tpu.memory_space<vmem>>, vector<64x640xbf16>
    %cst = arith.constant dense<0.000000e+00> : vector<16x640xf32>
    %13 = tpu.matmul %11, %12, %cst {dimension_numbers = #tpu.dot_dimension_numbers<[1], [0], [0], [1], [0, 0, 1, 1], [], []>} : vector<16x64xbf16>, vector<64x640xbf16>, vector<16x640xf32> -> vector<16x640xf32>
    %c0_14 = arith.constant 0 : index
    %c0_15 = arith.constant 0 : index
    %14 = vector.load %arg5[%c0_14, %c0_15] : memref<16x1xf32, #tpu.memory_space<vmem>>, vector<16x1xf32>
    %15 = vector.broadcast %14 : vector<16x1xf32> to vector<16x640xf32>
    %16 = arith.addf %13, %15 : vector<16x640xf32>
    %17 = arith.mulf %16, %2 : vector<16x640xf32>
    %cst_16 = arith.constant 0.000000e+00 : bf16
    %18 = vector.broadcast %cst_16 : bf16 to vector<16x128xbf16>
    %c0_17 = arith.constant 0 : index
    %c0_18 = arith.constant 0 : index
    %19 = vector.load %arg15[%c0_17, %c0_18] : memref<16x896xbf16, #tpu.memory_space<vmem>>, vector<16x128xbf16>
    tpu.vector_store %arg15[%c0_17, %c0_18], %18 {strides = array<i32>} : memref<16x896xbf16, #tpu.memory_space<vmem>>, vector<16x128xbf16>,
    %cst_19 = arith.constant 0.000000e+00 : bf16
    %20 = vector.broadcast %cst_19 : bf16 to vector<16x128xbf16>
    %c0_20 = arith.constant 0 : index
    %c768 = arith.constant 768 : index
    %21 = vector.load %arg15[%c0_20, %c768] : memref<16x896xbf16, #tpu.memory_space<vmem>>, vector<16x128xbf16>
    tpu.vector_store %arg15[%c0_20, %c768], %20 {strides = array<i32>} : memref<16x896xbf16, #tpu.memory_space<vmem>>, vector<16x128xbf16>,
    %22 = arith.truncf %17 : vector<16x640xf32> to vector<16x640xbf16>
    %c0_21 = arith.constant 0 : index
    %c128_22 = arith.constant 128 : index
    %23 = vector.load %arg15[%c0_21, %c128_22] : memref<16x896xbf16, #tpu.memory_space<vmem>>, vector<16x640xbf16>
    tpu.vector_store %arg15[%c0_21, %c128_22], %22 {strides = array<i32>} : memref<16x896xbf16, #tpu.memory_space<vmem>>, vector<16x640xbf16>,
    %c0_23 = arith.constant 0 : index
    %c109_24 = arith.constant 109 : index
    %24 = vector.load %arg15[%c0_23, %c109_24] : memref<16x896xbf16, #tpu.memory_space<vmem>>, vector<16x640xbf16>
    %c0_25 = arith.constant 0 : index
    %c0_26 = arith.constant 0 : index
    %25 = vector.load %arg18[%c0_25, %c0_26] : memref<288x640xbf16, #tpu.memory_space<vmem>>, vector<16x640xbf16>
    tpu.vector_store %arg18[%c0_25, %c0_26], %24 {strides = array<i32>} : memref<288x640xbf16, #tpu.memory_space<vmem>>, vector<16x640xbf16>,
    %c0_27 = arith.constant 0 : index
    %c109_28 = arith.constant 109 : index
    %26 = vector.load %arg2[%c0_27, %c109_28] : memref<16x896xbf16, #tpu.memory_space<vmem>>, vector<16x640xbf16>
    %c16_29 = arith.constant 16 : index
    %c0_30 = arith.constant 0 : index
    %27 = vector.load %arg18[%c16_29, %c0_30] : memref<288x640xbf16, #tpu.memory_space<vmem>>, vector<16x640xbf16>
    tpu.vector_store %arg18[%c16_29, %c0_30], %26 {strides = array<i32>} : memref<288x640xbf16, #tpu.memory_space<vmem>>, vector<16x640xbf16>,
    %c0_31 = arith.constant 0 : index
    %c110_32 = arith.constant 110 : index
    %28 = vector.load %arg15[%c0_31, %c110_32] : memref<16x896xbf16, #tpu.memory_space<vmem>>, vector<16x640xbf16>
    %c32_33 = arith.constant 32 : index
    %c0_34 = arith.constant 0 : index
    %29 = vector.load %arg18[%c32_33, %c0_34] : memref<288x640xbf16, #tpu.memory_space<vmem>>, vector<16x640xbf16>
    tpu.vector_store %arg18[%c32_33, %c0_34], %28 {strides = array<i32>} : memref<288x640xbf16, #tpu.memory_space<vmem>>, vector<16x640xbf16>,
    %c0_35 = arith.constant 0 : index
    %c110_36 = arith.constant 110 : index
    %30 = vector.load %arg2[%c0_35, %c110_36] : memref<16x896xbf16, #tpu.memory_space<vmem>>, vector<16x640xbf16>
    %c48_37 = arith.constant 48 : index
    %c0_38 = arith.constant 0 : index
    %31 = vector.load %arg18[%c48_37, %c0_38] : memref<288x640xbf16, #tpu.memory_space<vmem>>, vector<16x640xbf16>
    tpu.vector_store %arg18[%c48_37, %c0_38], %30 {strides = array<i32>} : memref<288x640xbf16, #tpu.memory_space<vmem>>, vector<16x640xbf16>,
    %c0_39 = arith.constant 0 : index
    %c111 = arith.constant 111 : index
    %32 = vector.load %arg15[%c0_39, %c111] : memref<16x896xbf16, #tpu.memory_space<vmem>>, vector<16x640xbf16>
    %c64 = arith.constant 64 : index
    %c0_40 = arith.constant 0 : index
    %33 = vector.load %arg18[%c64, %c0_40] : memref<288x640xbf16, #tpu.memory_space<vmem>>, vector<16x640xbf16>
    tpu.vector_store %arg18[%c64, %c0_40], %32 {strides = array<i32>} : memref<288x640xbf16, #tpu.memory_space<vmem>>, vector<16x640xbf16>,
    %c0_41 = arith.constant 0 : index
    %c111_42 = arith.constant 111 : index
    %34 = vector.load %arg2[%c0_41, %c111_42] : memref<16x896xbf16, #tpu.memory_space<vmem>>, vector<16x640xbf16>
    %c80 = arith.constant 80 : index
    %c0_43 = arith.constant 0 : index
    %35 = vector.load %arg18[%c80, %c0_43] : memref<288x640xbf16, #tpu.memory_space<vmem>>, vector<16x640xbf16>
    tpu.vector_store %arg18[%c80, %c0_43], %34 {strides = array<i32>} : memref<288x640xbf16, #tpu.memory_space<vmem>>, vector<16x640xbf16>,
    %c0_44 = arith.constant 0 : index
    %c127_45 = arith.constant 127 : index
    %36 = vector.load %arg15[%c0_44, %c127_45] : memref<16x896xbf16, #tpu.memory_space<vmem>>, vector<16x640xbf16>
    %c96 = arith.constant 96 : index
    %c0_46 = arith.constant 0 : index
    %37 = vector.load %arg18[%c96, %c0_46] : memref<288x640xbf16, #tpu.memory_space<vmem>>, vector<16x640xbf16>
    tpu.vector_store %arg18[%c96, %c0_46], %36 {strides = array<i32>} : memref<288x640xbf16, #tpu.memory_space<vmem>>, vector<16x640xbf16>,
    %c0_47 = arith.constant 0 : index
    %c127_48 = arith.constant 127 : index
    %38 = vector.load %arg2[%c0_47, %c127_48] : memref<16x896xbf16, #tpu.memory_space<vmem>>, vector<16x640xbf16>
    %c112 = arith.constant 112 : index
    %c0_49 = arith.constant 0 : index
    %39 = vector.load %arg18[%c112, %c0_49] : memref<288x640xbf16, #tpu.memory_space<vmem>>, vector<16x640xbf16>
    tpu.vector_store %arg18[%c112, %c0_49], %38 {strides = array<i32>} : memref<288x640xbf16, #tpu.memory_space<vmem>>, vector<16x640xbf16>,
    %c0_50 = arith.constant 0 : index
    %c128_51 = arith.constant 128 : index
    %40 = vector.load %arg15[%c0_50, %c128_51] : memref<16x896xbf16, #tpu.memory_space<vmem>>, vector<16x640xbf16>
    %c128_52 = arith.constant 128 : index
    %c0_53 = arith.constant 0 : index
    %41 = vector.load %arg18[%c128_52, %c0_53] : memref<288x640xbf16, #tpu.memory_space<vmem>>, vector<16x640xbf16>
    tpu.vector_store %arg18[%c128_52, %c0_53], %40 {strides = array<i32>} : memref<288x640xbf16, #tpu.memory_space<vmem>>, vector<16x640xbf16>,
    %c0_54 = arith.constant 0 : index
    %c128_55 = arith.constant 128 : index
    %42 = vector.load %arg2[%c0_54, %c128_55] : memref<16x896xbf16, #tpu.memory_space<vmem>>, vector<16x640xbf16>
    %c144 = arith.constant 144 : index
    %c0_56 = arith.constant 0 : index
    %43 = vector.load %arg18[%c144, %c0_56] : memref<288x640xbf16, #tpu.memory_space<vmem>>, vector<16x640xbf16>
    tpu.vector_store %arg18[%c144, %c0_56], %42 {strides = array<i32>} : memref<288x640xbf16, #tpu.memory_space<vmem>>, vector<16x640xbf16>,
    %c0_57 = arith.constant 0 : index
    %c129 = arith.constant 129 : index
    %44 = vector.load %arg15[%c0_57, %c129] : memref<16x896xbf16, #tpu.memory_space<vmem>>, vector<16x640xbf16>
    %c160 = arith.constant 160 : index
    %c0_58 = arith.constant 0 : index
    %45 = vector.load %arg18[%c160, %c0_58] : memref<288x640xbf16, #tpu.memory_space<vmem>>, vector<16x640xbf16>
    tpu.vector_store %arg18[%c160, %c0_58], %44 {strides = array<i32>} : memref<288x640xbf16, #tpu.memory_space<vmem>>, vector<16x640xbf16>,
    %c0_59 = arith.constant 0 : index
    %c129_60 = arith.constant 129 : index
    %46 = vector.load %arg2[%c0_59, %c129_60] : memref<16x896xbf16, #tpu.memory_space<vmem>>, vector<16x640xbf16>
    %c176 = arith.constant 176 : index
    %c0_61 = arith.constant 0 : index
    %47 = vector.load %arg18[%c176, %c0_61] : memref<288x640xbf16, #tpu.memory_space<vmem>>, vector<16x640xbf16>
    tpu.vector_store %arg18[%c176, %c0_61], %46 {strides = array<i32>} : memref<288x640xbf16, #tpu.memory_space<vmem>>, vector<16x640xbf16>,
    %c0_62 = arith.constant 0 : index
    %c145 = arith.constant 145 : index
    %48 = vector.load %arg15[%c0_62, %c145] : memref<16x896xbf16, #tpu.memory_space<vmem>>, vector<16x640xbf16>
    %c192 = arith.constant 192 : index
    %c0_63 = arith.constant 0 : index
    %49 = vector.load %arg18[%c192, %c0_63] : memref<288x640xbf16, #tpu.memory_space<vmem>>, vector<16x640xbf16>
    tpu.vector_store %arg18[%c192, %c0_63], %48 {strides = array<i32>} : memref<288x640xbf16, #tpu.memory_space<vmem>>, vector<16x640xbf16>,
    %c0_64 = arith.constant 0 : index
    %c145_65 = arith.constant 145 : index
    %50 = vector.load %arg2[%c0_64, %c145_65] : memref<16x896xbf16, #tpu.memory_space<vmem>>, vector<16x640xbf16>
    %c208 = arith.constant 208 : index
    %c0_66 = arith.constant 0 : index
    %51 = vector.load %arg18[%c208, %c0_66] : memref<288x640xbf16, #tpu.memory_space<vmem>>, vector<16x640xbf16>
    tpu.vector_store %arg18[%c208, %c0_66], %50 {strides = array<i32>} : memref<288x640xbf16, #tpu.memory_space<vmem>>, vector<16x640xbf16>,
    %c0_67 = arith.constant 0 : index
    %c146 = arith.constant 146 : index
    %52 = vector.load %arg15[%c0_67, %c146] : memref<16x896xbf16, #tpu.memory_space<vmem>>, vector<16x640xbf16>
    %c224 = arith.constant 224 : index
    %c0_68 = arith.constant 0 : index
    %53 = vector.load %arg18[%c224, %c0_68] : memref<288x640xbf16, #tpu.memory_space<vmem>>, vector<16x640xbf16>
    tpu.vector_store %arg18[%c224, %c0_68], %52 {strides = array<i32>} : memref<288x640xbf16, #tpu.memory_space<vmem>>, vector<16x640xbf16>,
    %c0_69 = arith.constant 0 : index
    %c146_70 = arith.constant 146 : index
    %54 = vector.load %arg2[%c0_69, %c146_70] : memref<16x896xbf16, #tpu.memory_space<vmem>>, vector<16x640xbf16>
    %c240 = arith.constant 240 : index
    %c0_71 = arith.constant 0 : index
    %55 = vector.load %arg18[%c240, %c0_71] : memref<288x640xbf16, #tpu.memory_space<vmem>>, vector<16x640xbf16>
    tpu.vector_store %arg18[%c240, %c0_71], %54 {strides = array<i32>} : memref<288x640xbf16, #tpu.memory_space<vmem>>, vector<16x640xbf16>,
    %c0_72 = arith.constant 0 : index
    %c147 = arith.constant 147 : index
    %56 = vector.load %arg15[%c0_72, %c147] : memref<16x896xbf16, #tpu.memory_space<vmem>>, vector<16x640xbf16>
    %c256 = arith.constant 256 : index
    %c0_73 = arith.constant 0 : index
    %57 = vector.load %arg18[%c256, %c0_73] : memref<288x640xbf16, #tpu.memory_space<vmem>>, vector<16x640xbf16>
    tpu.vector_store %arg18[%c256, %c0_73], %56 {strides = array<i32>} : memref<288x640xbf16, #tpu.memory_space<vmem>>, vector<16x640xbf16>,
    %c0_74 = arith.constant 0 : index
    %c147_75 = arith.constant 147 : index
    %58 = vector.load %arg2[%c0_74, %c147_75] : memref<16x896xbf16, #tpu.memory_space<vmem>>, vector<16x640xbf16>
    %c272 = arith.constant 272 : index
    %c0_76 = arith.constant 0 : index
    %59 = vector.load %arg18[%c272, %c0_76] : memref<288x640xbf16, #tpu.memory_space<vmem>>, vector<16x640xbf16>
    tpu.vector_store %arg18[%c272, %c0_76], %58 {strides = array<i32>} : memref<288x640xbf16, #tpu.memory_space<vmem>>, vector<16x640xbf16>,
    %c0_77 = arith.constant 0 : index
    %c0_78 = arith.constant 0 : index
    %60 = vector.load %arg6[%c0_77, %c0_78] : memref<16x288xbf16, #tpu.memory_space<vmem>>, vector<16x288xbf16>
    %c0_79 = arith.constant 0 : index
    %c0_80 = arith.constant 0 : index
    %61 = vector.load %arg18[%c0_79, %c0_80] : memref<288x640xbf16, #tpu.memory_space<vmem>>, vector<288x640xbf16>
    %cst_81 = arith.constant dense<0.000000e+00> : vector<16x640xf32>
    %62 = tpu.matmul %60, %61, %cst_81 {dimension_numbers = #tpu.dot_dimension_numbers<[1], [0], [0], [1], [0, 0, 1, 1], [], []>} : vector<16x288xbf16>, vector<288x640xbf16>, vector<16x640xf32> -> vector<16x640xf32>
    %c0_82 = arith.constant 0 : index
    %c0_83 = arith.constant 0 : index
    %63 = vector.load %arg7[%c0_82, %c0_83] : memref<16x1xf32, #tpu.memory_space<vmem>>, vector<16x1xf32>
    %64 = vector.broadcast %63 : vector<16x1xf32> to vector<16x640xf32>
    %65 = arith.addf %62, %64 : vector<16x640xf32>
    %cst_84 = arith.constant 0.000000e+00 : f32
    %66 = vector.broadcast %cst_84 : f32 to vector<16x640xf32>
    %67 = arith.maximumf %65, %66 : vector<16x640xf32>
    %68 = arith.mulf %67, %2 : vector<16x640xf32>
    %cst_85 = arith.constant dense<0.000000e+00> : vector<16xf32>
    %69 = vector.multi_reduction <add>, %68, %cst_85 [1] : vector<16x640xf32> to vector<16xf32>
    %70 = vector.shape_cast %69 : vector<16xf32> to vector<16x1xf32>
    %cst_86 = arith.constant 0.001953125 : f32
    %71 = vector.broadcast %cst_86 : f32 to vector<16x1xf32>
    %72 = arith.mulf %70, %71 : vector<16x1xf32>
    %73 = arith.mulf %68, %68 : vector<16x640xf32>
    %cst_87 = arith.constant dense<0.000000e+00> : vector<16xf32>
    %74 = vector.multi_reduction <add>, %73, %cst_87 [1] : vector<16x640xf32> to vector<16xf32>
    %75 = vector.shape_cast %74 : vector<16xf32> to vector<16x1xf32>
    %cst_88 = arith.constant 0.001953125 : f32
    %76 = vector.broadcast %cst_88 : f32 to vector<16x1xf32>
    %77 = arith.mulf %75, %76 : vector<16x1xf32>
    %c0_89 = arith.constant 0 : index
    %c0_90 = arith.constant 0 : index
    %78 = vector.load %arg8[%c0_89, %c0_90] : memref<16x1xf32, #tpu.memory_space<vmem>>, vector<16x1xf32>
    %79 = arith.mulf %72, %72 : vector<16x1xf32>
    %80 = arith.subf %77, %79 : vector<16x1xf32>
    %cst_91 = arith.constant 9.99999974E-6 : f32
    %81 = vector.broadcast %cst_91 : f32 to vector<16x1xf32>
    %82 = arith.addf %80, %81 : vector<16x1xf32>
    %83 = math.rsqrt %82 : vector<16x1xf32>
    %84 = arith.mulf %78, %83 : vector<16x1xf32>
    %85 = vector.broadcast %72 : vector<16x1xf32> to vector<16x640xf32>
    %86 = arith.subf %68, %85 : vector<16x640xf32>
    %87 = vector.broadcast %84 : vector<16x1xf32> to vector<16x640xf32>
    %88 = arith.mulf %87, %86 : vector<16x640xf32>
    %c0_92 = arith.constant 0 : index
    %c0_93 = arith.constant 0 : index
    %89 = vector.load %arg9[%c0_92, %c0_93] : memref<16x1xf32, #tpu.memory_space<vmem>>, vector<16x1xf32>
    %90 = vector.broadcast %89 : vector<16x1xf32> to vector<16x640xf32>
    %91 = arith.addf %88, %90 : vector<16x640xf32>
    %92 = arith.mulf %91, %2 : vector<16x640xf32>
    %cst_94 = arith.constant 0.000000e+00 : bf16
    %93 = vector.broadcast %cst_94 : bf16 to vector<16x128xbf16>
    %c0_95 = arith.constant 0 : index
    %c0_96 = arith.constant 0 : index
    %94 = vector.load %arg16[%c0_95, %c0_96] : memref<16x896xbf16, #tpu.memory_space<vmem>>, vector<16x128xbf16>
    tpu.vector_store %arg16[%c0_95, %c0_96], %93 {strides = array<i32>} : memref<16x896xbf16, #tpu.memory_space<vmem>>, vector<16x128xbf16>,
    %cst_97 = arith.constant 0.000000e+00 : bf16
    %95 = vector.broadcast %cst_97 : bf16 to vector<16x128xbf16>
    %c0_98 = arith.constant 0 : index
    %c768_99 = arith.constant 768 : index
    %96 = vector.load %arg16[%c0_98, %c768_99] : memref<16x896xbf16, #tpu.memory_space<vmem>>, vector<16x128xbf16>
    tpu.vector_store %arg16[%c0_98, %c768_99], %95 {strides = array<i32>} : memref<16x896xbf16, #tpu.memory_space<vmem>>, vector<16x128xbf16>,
    %97 = arith.truncf %92 : vector<16x640xf32> to vector<16x640xbf16>
    %c0_100 = arith.constant 0 : index
    %c128_101 = arith.constant 128 : index
    %98 = vector.load %arg16[%c0_100, %c128_101] : memref<16x896xbf16, #tpu.memory_space<vmem>>, vector<16x640xbf16>
    tpu.vector_store %arg16[%c0_100, %c128_101], %97 {strides = array<i32>} : memref<16x896xbf16, #tpu.memory_space<vmem>>, vector<16x640xbf16>,
    %c0_102 = arith.constant 0 : index
    %c109_103 = arith.constant 109 : index
    %99 = vector.load %arg16[%c0_102, %c109_103] : memref<16x896xbf16, #tpu.memory_space<vmem>>, vector<16x640xbf16>
    %c0_104 = arith.constant 0 : index
    %c0_105 = arith.constant 0 : index
    %100 = vector.load %arg19[%c0_104, %c0_105] : memref<144x640xbf16, #tpu.memory_space<vmem>>, vector<16x640xbf16>
    tpu.vector_store %arg19[%c0_104, %c0_105], %99 {strides = array<i32>} : memref<144x640xbf16, #tpu.memory_space<vmem>>, vector<16x640xbf16>,
    %c0_106 = arith.constant 0 : index
    %c110_107 = arith.constant 110 : index
    %101 = vector.load %arg16[%c0_106, %c110_107] : memref<16x896xbf16, #tpu.memory_space<vmem>>, vector<16x640xbf16>
    %c16_108 = arith.constant 16 : index
    %c0_109 = arith.constant 0 : index
    %102 = vector.load %arg19[%c16_108, %c0_109] : memref<144x640xbf16, #tpu.memory_space<vmem>>, vector<16x640xbf16>
    tpu.vector_store %arg19[%c16_108, %c0_109], %101 {strides = array<i32>} : memref<144x640xbf16, #tpu.memory_space<vmem>>, vector<16x640xbf16>,
    %c0_110 = arith.constant 0 : index
    %c111_111 = arith.constant 111 : index
    %103 = vector.load %arg16[%c0_110, %c111_111] : memref<16x896xbf16, #tpu.memory_space<vmem>>, vector<16x640xbf16>
    %c32_112 = arith.constant 32 : index
    %c0_113 = arith.constant 0 : index
    %104 = vector.load %arg19[%c32_112, %c0_113] : memref<144x640xbf16, #tpu.memory_space<vmem>>, vector<16x640xbf16>
    tpu.vector_store %arg19[%c32_112, %c0_113], %103 {strides = array<i32>} : memref<144x640xbf16, #tpu.memory_space<vmem>>, vector<16x640xbf16>,
    %c0_114 = arith.constant 0 : index
    %c127_115 = arith.constant 127 : index
    %105 = vector.load %arg16[%c0_114, %c127_115] : memref<16x896xbf16, #tpu.memory_space<vmem>>, vector<16x640xbf16>
    %c48_116 = arith.constant 48 : index
    %c0_117 = arith.constant 0 : index
    %106 = vector.load %arg19[%c48_116, %c0_117] : memref<144x640xbf16, #tpu.memory_space<vmem>>, vector<16x640xbf16>
    tpu.vector_store %arg19[%c48_116, %c0_117], %105 {strides = array<i32>} : memref<144x640xbf16, #tpu.memory_space<vmem>>, vector<16x640xbf16>,
    %c0_118 = arith.constant 0 : index
    %c128_119 = arith.constant 128 : index
    %107 = vector.load %arg16[%c0_118, %c128_119] : memref<16x896xbf16, #tpu.memory_space<vmem>>, vector<16x640xbf16>
    %c64_120 = arith.constant 64 : index
    %c0_121 = arith.constant 0 : index
    %108 = vector.load %arg19[%c64_120, %c0_121] : memref<144x640xbf16, #tpu.memory_space<vmem>>, vector<16x640xbf16>
    tpu.vector_store %arg19[%c64_120, %c0_121], %107 {strides = array<i32>} : memref<144x640xbf16, #tpu.memory_space<vmem>>, vector<16x640xbf16>,
    %c0_122 = arith.constant 0 : index
    %c129_123 = arith.constant 129 : index
    %109 = vector.load %arg16[%c0_122, %c129_123] : memref<16x896xbf16, #tpu.memory_space<vmem>>, vector<16x640xbf16>
    %c80_124 = arith.constant 80 : index
    %c0_125 = arith.constant 0 : index
    %110 = vector.load %arg19[%c80_124, %c0_125] : memref<144x640xbf16, #tpu.memory_space<vmem>>, vector<16x640xbf16>
    tpu.vector_store %arg19[%c80_124, %c0_125], %109 {strides = array<i32>} : memref<144x640xbf16, #tpu.memory_space<vmem>>, vector<16x640xbf16>,
    %c0_126 = arith.constant 0 : index
    %c145_127 = arith.constant 145 : index
    %111 = vector.load %arg16[%c0_126, %c145_127] : memref<16x896xbf16, #tpu.memory_space<vmem>>, vector<16x640xbf16>
    %c96_128 = arith.constant 96 : index
    %c0_129 = arith.constant 0 : index
    %112 = vector.load %arg19[%c96_128, %c0_129] : memref<144x640xbf16, #tpu.memory_space<vmem>>, vector<16x640xbf16>
    tpu.vector_store %arg19[%c96_128, %c0_129], %111 {strides = array<i32>} : memref<144x640xbf16, #tpu.memory_space<vmem>>, vector<16x640xbf16>,
    %c0_130 = arith.constant 0 : index
    %c146_131 = arith.constant 146 : index
    %113 = vector.load %arg16[%c0_130, %c146_131] : memref<16x896xbf16, #tpu.memory_space<vmem>>, vector<16x640xbf16>
    %c112_132 = arith.constant 112 : index
    %c0_133 = arith.constant 0 : index
    %114 = vector.load %arg19[%c112_132, %c0_133] : memref<144x640xbf16, #tpu.memory_space<vmem>>, vector<16x640xbf16>
    tpu.vector_store %arg19[%c112_132, %c0_133], %113 {strides = array<i32>} : memref<144x640xbf16, #tpu.memory_space<vmem>>, vector<16x640xbf16>,
    %c0_134 = arith.constant 0 : index
    %c147_135 = arith.constant 147 : index
    %115 = vector.load %arg16[%c0_134, %c147_135] : memref<16x896xbf16, #tpu.memory_space<vmem>>, vector<16x640xbf16>
    %c128_136 = arith.constant 128 : index
    %c0_137 = arith.constant 0 : index
    %116 = vector.load %arg19[%c128_136, %c0_137] : memref<144x640xbf16, #tpu.memory_space<vmem>>, vector<16x640xbf16>
    tpu.vector_store %arg19[%c128_136, %c0_137], %115 {strides = array<i32>} : memref<144x640xbf16, #tpu.memory_space<vmem>>, vector<16x640xbf16>,
    %c0_138 = arith.constant 0 : index
    %c0_139 = arith.constant 0 : index
    %117 = vector.load %arg10[%c0_138, %c0_139] : memref<16x144xbf16, #tpu.memory_space<vmem>>, vector<16x144xbf16>
    %c0_140 = arith.constant 0 : index
    %c0_141 = arith.constant 0 : index
    %118 = vector.load %arg19[%c0_140, %c0_141] : memref<144x640xbf16, #tpu.memory_space<vmem>>, vector<144x640xbf16>
    %cst_142 = arith.constant dense<0.000000e+00> : vector<16x640xf32>
    %119 = tpu.matmul %117, %118, %cst_142 {dimension_numbers = #tpu.dot_dimension_numbers<[1], [0], [0], [1], [0, 0, 1, 1], [], []>} : vector<16x144xbf16>, vector<144x640xbf16>, vector<16x640xf32> -> vector<16x640xf32>
    %c0_143 = arith.constant 0 : index
    %c0_144 = arith.constant 0 : index
    %120 = vector.load %arg11[%c0_143, %c0_144] : memref<16x1xf32, #tpu.memory_space<vmem>>, vector<16x1xf32>
    %121 = vector.broadcast %120 : vector<16x1xf32> to vector<16x640xf32>
    %122 = arith.addf %119, %121 : vector<16x640xf32>
    %cst_145 = arith.constant 0.000000e+00 : f32
    %123 = vector.broadcast %cst_145 : f32 to vector<16x640xf32>
    %124 = arith.maximumf %122, %123 : vector<16x640xf32>
    %125 = arith.mulf %124, %2 : vector<16x640xf32>
    %cst_146 = arith.constant dense<0.000000e+00> : vector<16xf32>
    %126 = vector.multi_reduction <add>, %125, %cst_146 [1] : vector<16x640xf32> to vector<16xf32>
    %127 = vector.shape_cast %126 : vector<16xf32> to vector<16x1xf32>
    %cst_147 = arith.constant 0.001953125 : f32
    %128 = vector.broadcast %cst_147 : f32 to vector<16x1xf32>
    %129 = arith.mulf %127, %128 : vector<16x1xf32>
    %130 = arith.mulf %125, %125 : vector<16x640xf32>
    %cst_148 = arith.constant dense<0.000000e+00> : vector<16xf32>
    %131 = vector.multi_reduction <add>, %130, %cst_148 [1] : vector<16x640xf32> to vector<16xf32>
    %132 = vector.shape_cast %131 : vector<16xf32> to vector<16x1xf32>
    %cst_149 = arith.constant 0.001953125 : f32
    %133 = vector.broadcast %cst_149 : f32 to vector<16x1xf32>
    %134 = arith.mulf %132, %133 : vector<16x1xf32>
    %c0_150 = arith.constant 0 : index
    %c0_151 = arith.constant 0 : index
    %135 = vector.load %arg12[%c0_150, %c0_151] : memref<16x1xf32, #tpu.memory_space<vmem>>, vector<16x1xf32>
    %136 = arith.mulf %129, %129 : vector<16x1xf32>
    %137 = arith.subf %134, %136 : vector<16x1xf32>
    %cst_152 = arith.constant 9.99999974E-6 : f32
    %138 = vector.broadcast %cst_152 : f32 to vector<16x1xf32>
    %139 = arith.addf %137, %138 : vector<16x1xf32>
    %140 = math.rsqrt %139 : vector<16x1xf32>
    %141 = arith.mulf %135, %140 : vector<16x1xf32>
    %142 = vector.broadcast %129 : vector<16x1xf32> to vector<16x640xf32>
    %143 = arith.subf %125, %142 : vector<16x640xf32>
    %144 = vector.broadcast %141 : vector<16x1xf32> to vector<16x640xf32>
    %145 = arith.mulf %144, %143 : vector<16x640xf32>
    %c0_153 = arith.constant 0 : index
    %c0_154 = arith.constant 0 : index
    %146 = vector.load %arg13[%c0_153, %c0_154] : memref<16x1xf32, #tpu.memory_space<vmem>>, vector<16x1xf32>
    %147 = vector.broadcast %146 : vector<16x1xf32> to vector<16x640xf32>
    %148 = arith.addf %145, %147 : vector<16x640xf32>
    %149 = arith.mulf %148, %2 : vector<16x640xf32>
    %c0_155 = arith.constant 0 : index
    %c0_156 = arith.constant 0 : index
    %150 = vector.load %arg14[%c0_155, %c0_156] : memref<16x640xf32, #tpu.memory_space<vmem>>, vector<16x640xf32>
    tpu.vector_store %arg14[%c0_155, %c0_156], %149 {strides = array<i32>} : memref<16x640xf32, #tpu.memory_space<vmem>>, vector<16x640xf32>,
    return
  }
  func.func @transform_0(%arg0: i32) -> (i32, i32) {
    %c0_i32 = arith.constant 0 : i32
    %c0_i32_0 = arith.constant 0 : i32
    %c0_i32_1 = arith.constant 0 : i32
    return %c0_i32, %c0_i32_0 : i32, i32
  }
  func.func @transform_1(%arg0: i32) -> (i32, i32) {
    %c0_i32 = arith.constant 0 : i32
    %c0_i32_0 = arith.constant 0 : i32
    %c0_i32_1 = arith.constant 0 : i32
    return %c0_i32, %c0_i32_0 : i32, i32
  }
  func.func @transform_2(%arg0: i32) -> (i32, i32) {
    %c0_i32 = arith.constant 0 : i32
    %c0_i32_0 = arith.constant 0 : i32
    %c0_i32_1 = arith.constant 0 : i32
    return %c0_i32, %c0_i32_0 : i32, i32
  }
  func.func @transform_3(%arg0: i32) -> (i32, i32) {
    %c0_i32 = arith.constant 0 : i32
    %c0_i32_0 = arith.constant 0 : i32
    %c0_i32_1 = arith.constant 0 : i32
    return %c0_i32, %c0_i32_0 : i32, i32
  }
  func.func @transform_4(%arg0: i32) -> (i32, i32) {
    %c0_i32 = arith.constant 0 : i32
    %c0_i32_0 = arith.constant 0 : i32
    %c0_i32_1 = arith.constant 0 : i32
    return %c0_i32, %c0_i32_0 : i32, i32
  }
  func.func @transform_5(%arg0: i32) -> (i32, i32) {
    %c0_i32 = arith.constant 0 : i32
    %c0_i32_0 = arith.constant 0 : i32
    %c0_i32_1 = arith.constant 0 : i32
    return %c0_i32, %c0_i32_0 : i32, i32
  }
  func.func @transform_6(%arg0: i32) -> (i32, i32) {
    %c0_i32 = arith.constant 0 : i32
    %c0_i32_0 = arith.constant 0 : i32
    %c0_i32_1 = arith.constant 0 : i32
    return %c0_i32, %c0_i32_0 : i32, i32
  }
  func.func @transform_7(%arg0: i32) -> (i32, i32) {
    %c0_i32 = arith.constant 0 : i32
    %c0_i32_0 = arith.constant 0 : i32
    %c0_i32_1 = arith.constant 0 : i32
    return %c0_i32, %c0_i32_0 : i32, i32
  }
  func.func @transform_8(%arg0: i32) -> (i32, i32) {
    %c0_i32 = arith.constant 0 : i32
    %c0_i32_0 = arith.constant 0 : i32
    %c0_i32_1 = arith.constant 0 : i32
    return %c0_i32, %c0_i32_0 : i32, i32
  }
  func.func @transform_9(%arg0: i32) -> (i32, i32) {
    %c0_i32 = arith.constant 0 : i32
    %c0_i32_0 = arith.constant 0 : i32
    %c0_i32_1 = arith.constant 0 : i32
    return %c0_i32, %c0_i32_0 : i32, i32
  }
  func.func @transform_10(%arg0: i32) -> (i32, i32) {
    %c0_i32 = arith.constant 0 : i32
    %c0_i32_0 = arith.constant 0 : i32
    %c0_i32_1 = arith.constant 0 : i32
    return %c0_i32, %c0_i32_0 : i32, i32
  }
  func.func @transform_11(%arg0: i32) -> (i32, i32) {
    %c0_i32 = arith.constant 0 : i32
    %c0_i32_0 = arith.constant 0 : i32
    %c0_i32_1 = arith.constant 0 : i32
    return %c0_i32, %c0_i32_0 : i32, i32
  }
  func.func @transform_12(%arg0: i32) -> (i32, i32) {
    %c0_i32 = arith.constant 0 : i32
    %c0_i32_0 = arith.constant 0 : i32
    %c0_i32_1 = arith.constant 0 : i32
    return %c0_i32, %c0_i32_0 : i32, i32
  }
  func.func @transform_13(%arg0: i32) -> (i32, i32) {
    %c0_i32 = arith.constant 0 : i32
    %c0_i32_0 = arith.constant 0 : i32
    %c0_i32_1 = arith.constant 0 : i32
    return %c0_i32, %c0_i32_0 : i32, i32
  }
}

</mosaic_0001>

<bundles_post_ra>
// kernel: unet_up_block.1
= control target key start
LH: loop header
LB: loop body
LE: loop exit
PB: predicated region body
PF: predicated region fallthrough
CT: control target
= control target key end

     0   :  { %s2706_s29 = smov 1   ;;  %s2707_s19 = smov 18   ;;  %v2708_v5 = vmov 0   ;;  %v2710_v7 = vmov 0.0   ;;  %vm2711_vm0 = vmmov 0   ;;  %vm151_vm1 = vcmask 7168   ;;  %s3884_s0 = inlined_call_operand.vmem [shape: bf16[16,896], index: 0, kind: input, shape index: {}]   ;;  %s3885_s3 = inlined_call_operand.vmem [shape: bf16[16,64], index: 3, kind: input, shape index: {}]   ;;  %s3886_s1 = inlined_call_operand.vmem [shape: bf16[16,896], index: 1, kind: input, shape index: {}]   ;;  %s3887_s4 = inlined_call_operand.vmem [shape: f32[16,1], index: 4, kind: input, shape index: {}]   ;;  %s3888_s2 = inlined_call_operand.vmem [shape: f32[1,640], index: 2, kind: input, shape index: {}]   ;;  %s3889_s5 = inlined_call_operand.vmem [shape: bf16[16,288], index: 5, kind: input, shape index: {}]   ;;  %s3890_s6 = inlined_call_operand.vmem [shape: f32[16,1], index: 6, kind: input, shape index: {}]   ;;  %s3891_s7 = inlined_call_operand.vmem [shape: f32[16,1], index: 7, kind: input, shape index: {}]   ;;  %s3892_s8 = inlined_call_operand.vmem [shape: f32[16,1], index: 8, kind: input, shape index: {}]   ;;  %s3893_s9 = inlined_call_operand.vmem [shape: bf16[16,144], index: 9, kind: input, shape index: {}]   ;;  %s3894_s10 = inlined_call_operand.vmem [shape: f32[16,1], index: 10, kind: input, shape index: {}]   ;;  %s3895_s11 = inlined_call_operand.vmem [shape: f32[16,1], index: 11, kind: input, shape index: {}]   ;;  %s3896_s12 = inlined_call_operand.vmem [shape: f32[16,1], index: 12, kind: input, shape index: {}]   ;;  %s3897_s13 = inlined_call_operand.vmem [shape: f32[16,640], index: 13, kind: output, shape index: {}]  }
   0x1   :  { %v2655_v0 = vld [vmem:[%s3884_s0 + $0x4] ss:$28 sps:$4 sm:$0xff]   ;;  %358 = vmatprep.mubr.bf16.mxu1 %v2708_v5  ;;  %2653 = vset.pattern.permute.xlu0 %v2708_v5  ;;  %v2671_v6 = vld [vmem:[%s3884_s0 + $0x14] ss:$28 sps:$4 sm:$0xff]   ;;  %s2709_s22 = smov 19   ;;  %v306_v12 = vld [vmem:[%s3887_s4 + $0x8] sm:$0xff]  ;;  %v47_v57 = vlaneseq }
   0x2   :  { %v2657_v1 = vld [vmem:[%s3884_s0] ss:$28 sps:$4 sm:$0xff]   ;;  %141 = vrot.lane.b32.xlu0 %v2655_v0, %s2706_s29  ;;  %v2658_v2 = vld [vmem:[%s3884_s0 + $0x8] ss:$28 sps:$4 sm:$0xff]   ;;  %2654 = vset.pattern.permute.xlu1 %v2708_v5  ;;  %v2661_v9 = vld [vmem:[%s3884_s0 + $0x10] ss:$28 sps:$4 sm:$0xff]  }
   0x3   :  { %139 = vrot.lane.b32.xlu1 %v2657_v1, %s2706_s29  ;;  %v2664_v3 = vld [vmem:[%s3884_s0 + $0x8] ss:$28 sps:$4 sm:$0xff]   ;;  %2606 = vmatprep.subr.bf16.mxu0 %v2710_v7  ;;  %v2663_v10 = vld [vmem:[%s3884_s0 + $0x14] ss:$28 sps:$4 sm:$0xff]   ;;  %v2676_v14 = vld [vmem:[%s3886_s1] ss:$28 sps:$4 sm:$0xff]  }
   0x4   :  { %v2666_v4 = vld [vmem:[%s3884_s0 + $0x4] ss:$28 sps:$4 sm:$0xff]   ;;  %326 = vmatprep.subr.bf16.mxu1 %v2664_v3  ;;  %v2660_v8 = vld [vmem:[%s3884_s0 + $0xc] ss:$28 sps:$4 sm:$0xff]   ;;  %2607 = vmatpush3.bf16.msra.mxu0 %v2671_v6  ;;  %s2713_s17 = smov 127   ;;  %s2714_s21 = smov 111  }
   0x5   :  { %327 = vmatpush1.bf16.msra.mxu1 %v2666_v4  ;;  %2608 = vmatprep.subr.bf16.mxu0 %v2710_v7  ;;  %v305_v11 = vld [vmem:[%s3887_s4] sm:$0xff]  ;;  %s2712_s4 = smov 17   ;;  %v2680_v16 = vld [vmem:[%s3886_s1 + $0x10] ss:$28 sps:$4 sm:$0xff]   ;;  %vm209_vm2 = vcmask 146432   ;;  %vm267_vm3 = vcmask 154624  }
   0x6   :  { %143 = vrot.lane.b32.xlu0 %v2658_v2, %s2706_s29  ;;  %2614 = vmatprep.mubr.msk.bf16.mxu0 %vm2711_vm0, %v2710_v7  ;;  %v2674_v13 = vld [vmem:[%s3886_s1 + $0x4] ss:$28 sps:$4 sm:$0xff]   ;;  %v2677_v17 = vld [vmem:[%s3886_s1 + $0xc] ss:$28 sps:$4 sm:$0xff]   ;;  %vm322_vm4 = vcmask 523264   ;;  %v48_v58 = vshrl.u32 %v47_v57, 7 }
   0x7   :  { %199 = vrot.lane.b32.xlu1 %v2655_v0, %s2707_s19  ;;  %v2672_v15 = vld [vmem:[%s3886_s1 + $0x8] ss:$28 sps:$4 sm:$0xff]   ;;  %v2670_v34 = vld [vmem:[%s3884_s0 + $0x10] ss:$28 sps:$4 sm:$0xff]   ;;  %vm691_vm5 = vcmask 138240   ;;  %vm931_vm6 = vcmask 1039360  }
   0x8   :  { %v2886_v18 = vld [vmem:[%s3886_s1 + $0x8] ss:$28 sps:$4 sm:$0xff]   ;;  %v49_v59 = vsub.s32 0, %v48_v58  ;;  %v53_v62 = vsub.s32 1, %v48_v58  ;;  %vm1028_vm7 = vcmask 908288   ;;  %vm1125_vm8 = vcmask 900096  }
   0x9   :  { %v2892_v19 = vld [vmem:[%s3886_s1 + $0xc] ss:$28 sps:$4 sm:$0xff]   ;;  %v2899_v20 = vld [vmem:[%s3886_s1 + $0x4] ss:$28 sps:$4 sm:$0xff]   ;;  %vm1222_vm9 = vcmask 891904   ;;  %vm1416_vm10 = vcmask 261120  }
   0xa   :  { %201 = vrot.lane.b32.xlu0 %v2658_v2, %s2707_s19  ;;  %v2667_v38 = vld [vmem:[%s3885_s3] sm:$0xff]   ;;  %v2668_v39 = vld [vmem:[%s3884_s0 + $0xc] ss:$28 sps:$4 sm:$0xff]   ;;  %s2715_s0 = smov 110   ;;  %vm2208_vm11 = vcmask 130048  }
   0xb   :  { %197 = vrot.lane.b32.xlu1 %v2657_v1, %s2707_s19  ;;  %v45_v61 = vld [vmem:[%s3888_s2] sm:$0x1f]  ;;  %s2716_s2 = smov 109  }
   0xc   :  { %v2956_v4 = vrot.slane %v45_v61, %v53_v62  ;;  %v3063_v62 = vld [vmem:[%s3889_s5 + $0x4] ss:$12 sps:$4 sm:$0xff]  }
   0xe   :  { %257 = vrot.lane.b32.xlu0 %v2655_v0, %s2709_s22 }
   0xf   :  { %259 = vrot.lane.b32.xlu1 %v2658_v2, %s2709_s22 }
  0x12   :  { %255 = vrot.lane.b32.xlu0 %v2657_v1, %s2709_s22  ;;  %v2954_v1 = vrot.slane %v45_v61, %v49_v59 }
  0x13   :  { %145 = vrot.lane.b32.xlu1 %v2660_v8, %s2706_s29 }
  0x16   :  { %147 = vrot.lane.b32.xlu0 %v2661_v9, %s2706_s29 }
  0x17   :  { %203 = vrot.lane.b32.xlu1 %v2660_v8, %s2707_s19 }
  0x1a   :  { %205 = vrot.lane.b32.xlu0 %v2661_v9, %s2707_s19 }
  0x1b   :  { %261 = vrot.lane.b32.xlu1 %v2660_v8, %s2709_s22 }
  0x1e   :  { %263 = vrot.lane.b32.xlu0 %v2661_v9, %s2709_s22 }
  0x1f   :  { %149 = vrot.lane.b32.xlu1 %v2663_v10, %s2706_s29 }
  0x22   :  { %207 = vrot.lane.b32.xlu0 %v2663_v10, %s2707_s19 }
  0x23   :  { %265 = vrot.lane.b32.xlu1 %v2663_v10, %s2709_s22 }
  0x26   :  { %309 = vperm.xlu0 %2653, %v305_v11  }
  0x27   :  { %314 = vperm.xlu1 %2654, %v306_v12  }
  0x2a   :  { %546 = vrot.lane.b32.xlu0 %v2674_v13, %s2709_s22 }
  0x2b   :  { %487 = vrot.lane.b32.xlu1 %v2708_v5, %s2709_s22 }
  0x2e   :  { %544 = vrot.lane.b32.xlu0 %v2676_v14, %s2709_s22 }
  0x2f   :  { %548 = vrot.lane.b32.xlu1 %v2672_v15, %s2709_s22 }
  0x32   :  { %642 = vrot.lane.b32.xlu0 %v2674_v13, %s2707_s19 }
  0x33   :  { %583 = vrot.lane.b32.xlu1 %v2708_v5, %s2707_s19 }
  0x36   :  { %640 = vrot.lane.b32.xlu0 %v2676_v14, %s2707_s19 }
  0x37   :  { %644 = vrot.lane.b32.xlu1 %v2672_v15, %s2707_s19 }
  0x3a   :  { %739 = vrot.lane.b32.xlu0 %v2674_v13, %s2712_s4 }
  0x3b   :  { %679 = vrot.lane.b32.xlu1 %v2708_v5, %s2712_s4 }
  0x3e   :  { %737 = vrot.lane.b32.xlu0 %v2676_v14, %s2712_s4 }
  0x3f   :  { %741 = vrot.lane.b32.xlu1 %v2672_v15, %s2712_s4 }
  0x42   :  { %835 = vrot.lane.b32.xlu0 %v2674_v13, %s2706_s29 }
  0x43   :  { %776 = vrot.lane.b32.xlu1 %v2708_v5, %s2706_s29 }
  0x46   :  { %833 = vrot.lane.b32.xlu0 %v2676_v14, %s2706_s29 }
  0x47   :  { %837 = vrot.lane.b32.xlu1 %v2672_v15, %s2706_s29 }
  0x4a   :  { %552 = vrot.lane.b32.xlu0 %v2680_v16, %s2709_s22 }
  0x4b   :  { %550 = vrot.lane.b32.xlu1 %v2677_v17, %s2709_s22 }
  0x4e   :  { %648 = vrot.lane.b32.xlu0 %v2680_v16, %s2707_s19 }
  0x4f   :  { %646 = vrot.lane.b32.xlu1 %v2677_v17, %s2707_s19 }
  0x52   :  { %979 = vrot.lane.b32.xlu0 %v2886_v18, %s2713_s17 }
  0x53   :  { %981 = vrot.lane.b32.xlu1 %v2892_v19, %s2713_s17 }
  0x56   :  { %977 = vrot.lane.b32.xlu0 %v2899_v20, %s2713_s17 }
  0x57   :  { %743 = vrot.lane.b32.xlu1 %v2677_v17, %s2712_s4 }
  0x5a   :  { %745 = vrot.lane.b32.xlu0 %v2680_v16, %s2712_s4 }
  0x5b   :  { %1078 = vrot.lane.b32.xlu1 %v2892_v19, %s2714_s21 }
  0x5e   :  { %1076 = vrot.lane.b32.xlu0 %v2886_v18, %s2714_s21 }
  0x5f   :  { %839 = vrot.lane.b32.xlu1 %v2677_v17, %s2706_s29 }
  0x62   :  { %1074 = vrot.lane.b32.xlu0 %v2899_v20, %s2714_s21 }
  0x63   :  { %1175 = vrot.lane.b32.xlu1 %v2892_v19, %s2715_s0 }
  0x66   :  { %841 = vrot.lane.b32.xlu0 %v2680_v16, %s2706_s29 }
  0x6a   :  { %1173 = vrot.lane.b32.xlu0 %v2886_v18, %s2715_s0 }
  0x6e   :  { %1171 = vrot.lane.b32.xlu0 %v2899_v20, %s2715_s0 }
  0x74   :  { %v142_v21 = vpop.permute.xlu0 %141 }
  0x75   :  { %v140_v22 = vpop.permute.xlu1 %139 }
  0x76   :  { %v152_v26 = vsel %vm151_vm1, %v140_v22, %v142_v21  ;;  %v61_v22 = vsub.s32 3, %v48_v58 }
  0x78   :  { %v144_v23 = vpop.permute.xlu0 %143 }
  0x79   :  { %v200_v24 = vpop.permute.xlu1 %199  ;;  %v153_v25 = vsel %vm151_vm1, %v142_v21, %v144_v23  ;;  %v57_v21 = vsub.s32 2, %v48_v58 }
  0x7a   :  { %328 = vmatprep.subr.bf16.mxu1 %v153_v25 }
  0x7b   :  { %329 = vmatpush1.bf16.msra.mxu1 %v152_v26  ;;  %v2976_v25 = vrot.slane %v45_v61, %v57_v21 }
  0x7c   :  { %v202_v27 = vpop.permute.xlu0 %201 }
  0x7d   :  { %v198_v28 = vpop.permute.xlu1 %197  ;;  %v211_v29 = vsel %vm209_vm2, %v200_v24, %v202_v27 }
  0x7e   :  { %330 = vmatprep.subr.bf16.mxu1 %v211_v29  ;;  %v210_v30 = vsel %vm209_vm2, %v198_v28, %v200_v24  ;;  %v2980_v28 = vrot.slane %v45_v61, %v61_v22 }
  0x7f   :  { %331 = vmatpush1.bf16.msra.mxu1 %v210_v30 }
  0x80   :  { %v258_v31 = vpop.permute.xlu0 %257 }
  0x81   :  { %v260_v32 = vpop.permute.xlu1 %259 }
  0x82   :  { %v269_v33 = vsel %vm267_vm3, %v258_v31, %v260_v32 }
  0x83   :  { %332 = vmatprep.subr.bf16.mxu1 %v269_v33 }
  0x84   :  { %v256_v35 = vpop.permute.xlu0 %255 }
  0x85   :  { %v146_v36 = vpop.permute.xlu1 %145  ;;  %v268_v37 = vsel %vm267_vm3, %v256_v35, %v258_v31  ;;  %v65_v31 = vsub.s32 4, %v48_v58 }
  0x86   :  { %333 = vmatpush1.bf16.msra.mxu1 %v268_v37  ;;  %v154_v45 = vsel %vm151_vm1, %v144_v23, %v146_v36 }
  0x87   :  { %369 = vmatprep.subr.bf16.mxu1 %v2670_v34 }
  0x88   :  { %v148_v40 = vpop.permute.xlu0 %147 }
  0x89   :  { %v204_v41 = vpop.permute.xlu1 %203  ;;  %2509 = vmatmul.mubr.msk.bf16.vlgmr.msra.gmra.mrb[0].mxu1 %vm322_vm4, %v2667_v38  ;;  %v155_v42 = vsel %vm151_vm1, %v146_v36, %v148_v40 }
  0x8a   :  { %370 = vmatpush1.bf16.msra.mxu1 %v2668_v39  ;;  %401 = vmatprep.mubr.bf16.mxu1 %v2708_v5  ;;  %v212_v49 = vsel %vm209_vm2, %v202_v27, %v204_v41 }
  0x8b   :  { %371 = vmatprep.subr.bf16.mxu1 %v155_v42 }
  0x8c   :  { %v206_v43 = vpop.permute.xlu0 %205 }
  0x8d   :  { %v262_v44 = vpop.permute.xlu1 %261  ;;  %v213_v46 = vsel %vm209_vm2, %v204_v41, %v206_v43 }
  0x8e   :  { %372 = vmatpush1.bf16.msra.mxu1 %v154_v45  ;;  %v270_v53 = vsel %vm267_vm3, %v260_v32, %v262_v44 }
  0x8f   :  { %373 = vmatprep.subr.bf16.mxu1 %v213_v46 }
  0x90   :  { %v264_v47 = vpop.permute.xlu0 %263 }
  0x91   :  { %v150_v48 = vpop.permute.xlu1 %149  ;;  %v271_v50 = vsel %vm267_vm3, %v262_v44, %v264_v47 }
  0x92   :  { %374 = vmatpush1.bf16.msra.mxu1 %v212_v49  ;;  %v156_v51 = vsel %vm151_vm1, %v148_v40, %v150_v48  ;;  %v2990_v40 = vrot.slane %v45_v61, %v65_v31 }
  0x93   :  { %2609 = vmatpush3.bf16.msra.mxu0 %v156_v51  ;;  %375 = vmatprep.subr.bf16.mxu1 %v271_v50 }
  0x94   :  { %v208_v52 = vpop.permute.xlu0 %207  ;;  %2610 = vmatprep.subr.bf16.mxu0 %v2710_v7 }
  0x95   :  { %v214_v54 = vsel %vm209_vm2, %v206_v43, %v208_v52  ;;  %v266_v55 = vpop.permute.xlu1 %265 }
  0x96   :  { %376 = vmatpush1.bf16.msra.mxu1 %v270_v53  ;;  %v272_v56 = vsel %vm267_vm3, %v264_v47, %v266_v55 }
  0x97   :  { %2611 = vmatpush3.bf16.msra.mxu0 %v214_v54 }
  0x98   :  { %2612 = vmatprep.subr.bf16.mxu0 %v2710_v7 }
  0x99   :  { %2510 = vmatmul.mubr.msk.bf16.vlgmr.msra.gmra.mrb[4].mxu1 %vm322_vm4, %v2667_v38 }
  0x9a   :  { %1452 = vmatprep.mubr.bf16.mxu1 %v3063_v62 }
  0x9b   :  { %2613 = vmatpush3.bf16.msra.mxu0 %v272_v56 }
  0x9e   :  { %2615 = vmatmul.mubr.msk.bf16.vlgmr.msra.gmra.mrb[0].mxu0 %vm322_vm4, %v2667_v38 }
  0x9f   :  { %1538 = vmatprep.mubr.bf16.mxu0 %v3063_v62 }
  0xa5   :  { %v310_v60 = vpop.permute.xlu0 %309 }
  0xa6   :  { %v315_v0 = vpop.permute.xlu1 %314 }
  0xa9   :  { %v2974_v24 = vpop.permute.xlu0 %546 }
  0xaa   :  { %v3020_v54 = vpop.permute.xlu1 %487 }
  0xad   :  { %v2994_v43 = vpop.permute.xlu0 %544 }
  0xae   :  { %v3032_v56 = vpop.permute.xlu1 %548 }
  0xb1   :  { %v3008_v52 = vpop.permute.xlu0 %642 }
  0xb2   :  { %v3040_v58 = vpop.permute.xlu1 %583 }
  0xb5   :  { %v3018_v53 = vpop.permute.xlu0 %640 }
  0xb9   :  { %v3026_v55 = vpop.permute.xlu0 %739 }
  0xbd   :  { %v3038_v57 = vpop.permute.xlu0 %737 }
  0xc1   :  { %v3046_v59 = vpop.permute.xlu0 %835 }
  0xc5   :  { %v3058_v61 = vpop.permute.xlu0 %833 }
 0x15c   :  { %v360_v63 = vpop.f32.mrb[0].mxu1 }
 0x15d   :  { %v361_v2 = vadd.f32 %v360_v63, %v310_v60  ;;  %v362_v3 = vpop.f32.mrb[1].mxu1 }
 0x15e   :  { %v363_v6 = vadd.f32 %v362_v3, %v310_v60  ;;  %v364_v8 = vpop.f32.mrb[2].mxu1  ;;  %v2687_v3 = vld [vmem:[%s3886_s1 + $0x14] ss:$28 sps:$4 sm:$0xff]  }
 0x15f   :  { %v365_v9 = vadd.f32 %v364_v8, %v315_v0  ;;  %v366_v10 = vpop.f32.mrb[3].mxu1  ;;  %v453_v12 = vmul.f32 %v361_v2, %v2954_v1  ;;  %v3078_v2 = vpop.permute.xlu0 %552  ;;  %v2685_v8 = vld [vmem:[%s3886_s1 + $0x14] ss:$28 sps:$4 sm:$0xff]  }
 0x160   :  { %v367_v11 = vadd.f32 %v366_v10, %v315_v0  ;;  %v454_v14 = vmul.f32 %v363_v6, %v2956_v4 }
 0x161   :  { %v458_v13 = vmul.f32 %v365_v9, %v2954_v1 }
 0x162   :  { %v459_v15 = vmul.f32 %v367_v11, %v2956_v4 }
 0x163   :  { %v2962_v16 = vpack.c.bf16 %v458_v13, %v453_v12  ;;  %v3095_v9 = vpop.permute.xlu0 %648 }
 0x164   :  { %v2964_v17 = vpack.c.bf16 %v459_v15, %v454_v14 }
 0x165   :  { %489 = vrot.lane.b32.xlu1 %v2962_v16, %s2709_s22 }
 0x166   :  { %491 = vrot.lane.b32.xlu0 %v2964_v17, %s2709_s22 }
 0x167   :  { %v3102_v11 = vpop.permute.xlu0 %979 }
 0x169   :  { %585 = vrot.lane.b32.xlu1 %v2962_v16, %s2707_s19 }
 0x16a   :  { %587 = vrot.lane.b32.xlu0 %v2964_v17, %s2707_s19 }
 0x16b   :  { %v3113_v13 = vpop.permute.xlu0 %977 }
 0x16c   :  { %v403_v23 = vpop.f32.mrb[4].mxu1 }
 0x16d   :  { %v404_v26 = vadd.f32 %v403_v23, %v310_v60  ;;  %v405_v27 = vpop.f32.mrb[5].mxu1  ;;  %681 = vrot.lane.b32.xlu1 %v2962_v16, %s2712_s4 }
 0x16e   :  { %v406_v29 = vadd.f32 %v405_v27, %v310_v60  ;;  %v407_v30 = vpop.f32.mrb[6].mxu1  ;;  %683 = vrot.lane.b32.xlu0 %v2964_v17, %s2712_s4 }
 0x16f   :  { %v408_v32 = vadd.f32 %v407_v30, %v315_v0  ;;  %v409_v33 = vpop.f32.mrb[7].mxu1  ;;  %v455_v35 = vmul.f32 %v404_v26, %v2976_v25  ;;  %v3121_v15 = vpop.permute.xlu0 %745  ;;  %v2689_v26 = vld [vmem:[%s3886_s1 + $0x18] ss:$28 sps:$4 sm:$0xff]  }
 0x170   :  { %v410_v34 = vadd.f32 %v409_v33, %v315_v0  ;;  %v456_v38 = vmul.f32 %v406_v29, %v2980_v28 }
 0x171   :  { %v460_v36 = vmul.f32 %v408_v32, %v2976_v25  ;;  %v446_v37 = vpop.f32.mrb[0].mxu0  ;;  %778 = vrot.lane.b32.xlu1 %v2962_v16, %s2706_s29 }
 0x172   :  { %v461_v39 = vmul.f32 %v410_v34, %v2980_v28  ;;  %v447_v41 = vadd.f32 %v446_v37, %v310_v60  ;;  %v2616_v42 = vpop.f32.mrb[1].mxu0  ;;  %780 = vrot.lane.b32.xlu0 %v2964_v17, %s2706_s29  ;;  %v3052_v60 = vpop.permute.xlu1 %644 }
 0x173   :  { %v2996_v44 = vpack.c.bf16 %v460_v36, %v455_v35  ;;  %v449_v45 = vpop.f32.mrb[2].mxu0  ;;  %v3132_v22 = vpop.permute.xlu0 %1076  ;;  %v557_v42 = vsel %vm267_vm3, %v2974_v24, %v3032_v56 }
 0x174   :  { %v2998_v46 = vpack.c.bf16 %v461_v39, %v456_v38  ;;  %v450_v47 = vadd.f32 %v449_v45, %v315_v0  ;;  %v2617_v48 = vpop.f32.mrb[3].mxu0  ;;  %v457_v49 = vmul.f32 %v447_v41, %v2990_v40  ;;  %v3072_v0 = vld [vmem:[%s3886_s1 + $0x10] ss:$28 sps:$4 sm:$0xff]  }
 0x175   :  { %919 = vrot.lane.b32.xlu1 %v2962_v16, %s2713_s17  ;;  %v1390_v45 = vld [vmem:[%s3890_s6 + $0x8] sm:$0xff]  ;;  %v556_v48 = vsel %vm267_vm3, %v2994_v43, %v2974_v24  ;;  %v653_v24 = vsel %vm209_vm2, %v3008_v52, %v3052_v60 }
 0x176   :  { %v462_v50 = vmul.f32 %v450_v47, %v2990_v40  ;;  %493 = vrot.lane.b32.xlu0 %v2996_v44, %s2709_s22  ;;  %v3065_v63 = vpop.permute.xlu1 %679 }
 0x177   :  { %v3142_v27 = vpop.permute.xlu0 %1074 }
 0x178   :  { %v3006_v51 = vpack.c.bf16 %v462_v50, %v457_v49 }
 0x179   :  { %1016 = vrot.lane.b32.xlu1 %v2962_v16, %s2714_s21 }
 0x17a   :  { %923 = vrot.lane.b32.xlu0 %v2996_v44, %s2713_s17  ;;  %v3087_v6 = vpop.permute.xlu1 %741 }
 0x17b   :  { %v3152_v30 = vpop.permute.xlu0 %841 }
 0x17d   :  { %1113 = vrot.lane.b32.xlu1 %v2962_v16, %s2715_s0 }
 0x17e   :  { %685 = vrot.lane.b32.xlu0 %v2996_v44, %s2712_s4  ;;  %v3097_v10 = vpop.permute.xlu1 %776 }
 0x17f   :  { %v3160_v32 = vpop.permute.xlu0 %1173 }
 0x181   :  { %921 = vrot.lane.b32.xlu1 %v2964_v17, %s2713_s17 }
 0x182   :  { %1020 = vrot.lane.b32.xlu0 %v2996_v44, %s2714_s21  ;;  %v3107_v12 = vpop.permute.xlu1 %837 }
 0x183   :  { %v3172_v35 = vpop.permute.xlu0 %1171 }
 0x185   :  { %1018 = vrot.lane.b32.xlu1 %v2964_v17, %s2714_s21 }
 0x186   :  { %782 = vrot.lane.b32.xlu0 %v2996_v44, %s2706_s29  ;;  %v3115_v14 = vpop.permute.xlu1 %550 }
 0x189   :  { %1115 = vrot.lane.b32.xlu1 %v2964_v17, %s2715_s0 }
 0x18a   :  { %1117 = vrot.lane.b32.xlu0 %v2996_v44, %s2715_s0  ;;  %v3123_v21 = vpop.permute.xlu1 %646 }
 0x18d   :  { %1212 = vrot.lane.b32.xlu1 %v2964_v17, %s2716_s2 }
 0x18e   :  { %1214 = vrot.lane.b32.xlu0 %v2996_v44, %s2716_s2  ;;  %v3134_v23 = vpop.permute.xlu1 %981 }
 0x191   :  { %589 = vrot.lane.b32.xlu1 %v2996_v44, %s2707_s19 }
 0x192   :  { %591 = vrot.lane.b32.xlu0 %v2998_v46, %s2707_s19  ;;  %v3144_v29 = vpop.permute.xlu1 %743 }
 0x195   :  { %495 = vrot.lane.b32.xlu1 %v2998_v46, %s2709_s22 }
 0x196   :  { %927 = vrot.lane.b32.xlu0 %v3006_v51, %s2713_s17  ;;  %v3154_v31 = vpop.permute.xlu1 %1078 }
 0x199   :  { %1210 = vrot.lane.b32.xlu1 %v2962_v16, %s2716_s2 }
 0x19a   :  { %1270 = vrot.lane.b32.xlu0 %v2886_v18, %s2716_s2  ;;  %v3162_v33 = vpop.permute.xlu1 %839 }
 0x19d   :  { %1272 = vrot.lane.b32.xlu1 %v2892_v19, %s2716_s2 }
 0x19e   :  { %983 = vrot.lane.b32.xlu0 %v3072_v0, %s2713_s17  ;;  %v3169_v34 = vpop.permute.xlu1 %1175 }
 0x1a1   :  { %985 = vrot.lane.b32.xlu1 %v2687_v3, %s2713_s17 }
 0x1a2   :  { %1268 = vrot.lane.b32.xlu0 %v2899_v20, %s2716_s2 }
 0x1a5   :  { %687 = vrot.lane.b32.xlu1 %v2998_v46, %s2712_s4 }
 0x1a6   :  { %554 = vrot.lane.b32.xlu0 %v2685_v8, %s2709_s22 }
 0x1a9   :  { %497 = vrot.lane.b32.xlu1 %v3006_v51, %s2709_s22 }
 0x1aa   :  { %1082 = vrot.lane.b32.xlu0 %v2687_v3, %s2714_s21 }
 0x1ad   :  { %784 = vrot.lane.b32.xlu1 %v2998_v46, %s2706_s29 }
 0x1ae   :  { %593 = vrot.lane.b32.xlu0 %v3006_v51, %s2707_s19 }
 0x1b1   :  { %1024 = vrot.lane.b32.xlu1 %v3006_v51, %s2714_s21 }
 0x1b2   :  { %1121 = vrot.lane.b32.xlu0 %v3006_v51, %s2715_s0 }
 0x1b5   :  { %1080 = vrot.lane.b32.xlu1 %v3072_v0, %s2714_s21 }
 0x1b6   :  { %650 = vrot.lane.b32.xlu0 %v2685_v8, %s2707_s19 }
 0x1b9   :  { %929 = vrot.lane.b32.xlu1 %v2708_v5, %s2713_s17 }
 0x1ba   :  { %1022 = vrot.lane.b32.xlu0 %v2998_v46, %s2714_s21 }
 0x1bd   :  { %925 = vrot.lane.b32.xlu1 %v2998_v46, %s2713_s17 }
 0x1be   :  { %1179 = vrot.lane.b32.xlu0 %v2687_v3, %s2715_s0 }
 0x1c1   :  { %987 = vrot.lane.b32.xlu1 %v2689_v26, %s2713_s17 }
 0x1c2   :  { %689 = vrot.lane.b32.xlu0 %v3006_v51, %s2712_s4 }
 0x1c5   :  { %1177 = vrot.lane.b32.xlu1 %v3072_v0, %s2715_s0 }
 0x1c6   :  { %747 = vrot.lane.b32.xlu0 %v2685_v8, %s2712_s4 }
 0x1c9   :  { %1026 = vrot.lane.b32.xlu1 %v2708_v5, %s2714_s21 }
 0x1ca   :  { %1218 = vrot.lane.b32.xlu0 %v3006_v51, %s2716_s2 }
 0x1cd   :  { %1119 = vrot.lane.b32.xlu1 %v2998_v46, %s2715_s0 }
 0x1ce   :  { %786 = vrot.lane.b32.xlu0 %v3006_v51, %s2706_s29 }
 0x1d1   :  { %1084 = vrot.lane.b32.xlu1 %v2689_v26, %s2714_s21 }
 0x1d2   :  { %1276 = vrot.lane.b32.xlu0 %v2687_v3, %s2716_s2 }
 0x1d5   :  { %1123 = vrot.lane.b32.xlu1 %v2708_v5, %s2715_s0 }
 0x1d6   :  { %843 = vrot.lane.b32.xlu0 %v2685_v8, %s2706_s29 }
 0x1d7   :  { %v490_v36 = vpop.permute.xlu1 %489 }
 0x1d8   :  { %v3177_v37 = vpop.permute.xlu0 %491  ;;  %v499_v39 = vsel %vm267_vm3, %v3020_v54, %v490_v36 }
 0x1d9   :  { %1216 = vrot.lane.b32.xlu1 %v2998_v46, %s2716_s2  ;;  %v500_v38 = vsel %vm267_vm3, %v490_v36, %v3177_v37  ;;  %v652_v36 = vsel %vm209_vm2, %v3018_v53, %v3008_v52  ;;  %v750_v52 = vsel %vm691_vm5, %v3026_v55, %v3087_v6 }
 0x1da   :  { %1278 = vrot.lane.b32.xlu0 %v2689_v26, %s2716_s2  ;;  %1420 = vmatprep.subr.bf16.mxu1 %v500_v38 }
 0x1db   :  { %1421 = vmatpush1.bf16.msra.mxu1 %v499_v39  ;;  %v586_v41 = vpop.permute.xlu1 %585 }
 0x1dc   :  { %v3192_v47 = vpop.permute.xlu0 %587  ;;  %1422 = vmatprep.subr.bf16.mxu1 %v557_v42  ;;  %v595_v3 = vsel %vm209_vm2, %v3040_v58, %v586_v41  ;;  %v1389_v58 = vld [vmem:[%s3890_s6] sm:$0xff] }
 0x1dd   :  { %1274 = vrot.lane.b32.xlu1 %v3072_v0, %s2716_s2  ;;  %v596_v50 = vsel %vm209_vm2, %v586_v41, %v3192_v47 }
 0x1de   :  { %1398 = vperm.xlu0 %2653, %v1390_v45   ;;  %v749_v45 = vsel %vm691_vm5, %v3038_v57, %v3026_v55  ;;  %v845_v55 = vsel %vm151_vm1, %v3058_v61, %v3046_v59 }
 0x1df   :  { %1423 = vmatpush1.bf16.msra.mxu1 %v556_v48  ;;  %v682_v49 = vpop.permute.xlu1 %681 }
 0x1e0   :  { %v3201_v54 = vpop.permute.xlu0 %683  ;;  %1424 = vmatprep.subr.bf16.mxu1 %v596_v50  ;;  %v692_v41 = vsel %vm691_vm5, %v3065_v63, %v682_v49 }
 0x1e1   :  { %1181 = vrot.lane.b32.xlu1 %v2689_v26, %s2715_s0  ;;  %v693_v38 = vsel %vm691_vm5, %v682_v49, %v3201_v54 }
 0x1e3   :  { %1425 = vmatpush1.bf16.msra.mxu1 %v595_v3  ;;  %v779_v8 = vpop.permute.xlu1 %778 }
 0x1e4   :  { %v3209_v43 = vpop.permute.xlu0 %780  ;;  %1426 = vmatprep.subr.bf16.mxu1 %v653_v24  ;;  %v788_v49 = vsel %vm151_vm1, %v3097_v10, %v779_v8  ;;  %v846_v24 = vsel %vm151_vm1, %v3046_v59, %v3107_v12 }
 0x1e5   :  { %1220 = vrot.lane.b32.xlu1 %v2708_v5, %s2716_s2  ;;  %v789_v50 = vsel %vm151_vm1, %v779_v8, %v3209_v43 }
 0x1e7   :  { %1427 = vmatpush1.bf16.msra.mxu1 %v652_v36  ;;  %v920_v26 = vpop.permute.xlu1 %919 }
 0x1e8   :  { %v494_v39 = vpop.permute.xlu0 %493  ;;  %1428 = vmatprep.subr.bf16.mxu1 %v693_v38 }
 0x1e9   :  { %1393 = vperm.xlu1 %2654, %v1389_v58  }
 0x1eb   :  { %1429 = vmatpush1.bf16.msra.mxu1 %v692_v41  ;;  %v1017_v42 = vpop.permute.xlu1 %1016  ;;  %v990_v41 = vsel %vm931_vm6, %v3102_v11, %v3134_v23 }
 0x1ec   :  { %v3226_v53 = vpop.permute.xlu0 %923  ;;  %1430 = vmatprep.subr.bf16.mxu1 %v750_v52 }
 0x1ef   :  { %1431 = vmatpush1.bf16.msra.mxu1 %v749_v45  ;;  %v3231_v48 = vpop.permute.xlu1 %1113 }
 0x1f0   :  { %v3235_v63 = vpop.permute.xlu0 %685  ;;  %1432 = vmatprep.subr.bf16.mxu1 %v789_v50 }
 0x1f3   :  { %1433 = vmatpush1.bf16.msra.mxu1 %v788_v49  ;;  %v922_v3 = vpop.permute.xlu1 %921  ;;  %v501_v49 = vsel %vm267_vm3, %v3177_v37, %v494_v39  ;;  %v558_v37 = vsel %vm267_vm3, %v3032_v56, %v3115_v14 }
 0x1f4   :  { %v3242_v36 = vpop.permute.xlu0 %1020  ;;  %1434 = vmatprep.subr.bf16.mxu1 %v846_v24  ;;  %v933_v59 = vsel %vm931_vm6, %v922_v3, %v3226_v53  ;;  %v1087_v24 = vsel %vm1028_vm7, %v3132_v22, %v3154_v31 }
 0x1f7   :  { %1435 = vmatpush1.bf16.msra.mxu1 %v845_v55  ;;  %v1019_v57 = vpop.permute.xlu1 %1018 }
 0x1f8   :  { %v3247_v58 = vpop.permute.xlu0 %782  ;;  %1436 = vmatprep.subr.bf16.mxu1 %v2964_v17  ;;  %v932_v17 = vsel %vm931_vm6, %v920_v26, %v922_v3  ;;  %v1030_v26 = vsel %vm1028_vm7, %v1019_v57, %v3242_v36 }
 0x1fb   :  { %1437 = vmatpush1.bf16.msra.mxu1 %v2962_v16  ;;  %v1116_v10 = vpop.permute.xlu1 %1115 }
 0x1fc   :  { %v3251_v8 = vpop.permute.xlu0 %1117  ;;  %1438 = vmatprep.subr.bf16.mxu1 %v2886_v18 }
 0x1ff   :  { %1439 = vmatpush1.bf16.msra.mxu1 %v2899_v20  ;;  %v3255_v38 = vpop.permute.xlu1 %1212  ;;  %v989_v20 = vsel %vm931_vm6, %v3113_v13, %v3102_v11  ;;  %v1029_v11 = vsel %vm1028_vm7, %v1017_v42, %v1019_v57  ;;  %v559_v13 = vsel %vm267_vm3, %v3115_v14, %v3078_v2  ;;  %v1126_v14 = vsel %vm1125_vm8, %v3231_v48, %v1116_v10 }
 0x200   :  { %v3259_v61 = vpop.permute.xlu0 %1214  ;;  %1440 = vmatprep.subr.bf16.mxu1 %v933_v59  ;;  %v1127_v59 = vsel %vm1125_vm8, %v1116_v10, %v3251_v8  ;;  %v1183_v48 = vsel %vm1125_vm8, %v3172_v35, %v3160_v32  ;;  %v3322_v10 = vld [vmem:[%s3889_s5] ss:$12 sps:$4 sm:$0xff]   ;;  %v752_v35 = vsel %vm691_vm5, %v3144_v29, %v3121_v15 }
 0x203   :  { %1441 = vmatpush1.bf16.msra.mxu1 %v932_v17  ;;  %v590_v16 = vpop.permute.xlu1 %589 }
 0x204   :  { %v3265_v18 = vpop.permute.xlu0 %591  ;;  %1442 = vmatprep.subr.bf16.mxu1 %v990_v41  ;;  %v597_v56 = vsel %vm209_vm2, %v3192_v47, %v590_v16  ;;  %v1184_v41 = vsel %vm1125_vm8, %v3160_v32, %v3169_v34  ;;  %v654_v47 = vsel %vm209_vm2, %v3052_v60, %v3123_v21 }
 0x205   :  { %v598_v42 = vsel %vm209_vm2, %v590_v16, %v3265_v18 }
 0x207   :  { %1443 = vmatpush1.bf16.msra.mxu1 %v989_v20  ;;  %v3270_v52 = vpop.permute.xlu1 %495 }
 0x208   :  { %v3274_v45 = vpop.permute.xlu0 %927  ;;  %1444 = vmatprep.subr.bf16.mxu1 %v1030_v26  ;;  %v502_v50 = vsel %vm267_vm3, %v494_v39, %v3270_v52  ;;  %v1086_v39 = vsel %vm1028_vm7, %v3142_v27, %v3132_v22  ;;  %v655_v22 = vsel %vm209_vm2, %v3123_v21, %v3095_v9  ;;  %v1224_v26 = vsel %vm1222_vm9, %v3255_v38, %v3259_v61 }
 0x209   :  { %1506 = vmatprep.subr.bf16.mxu0 %v502_v50  ;;  %v694_v21 = vsel %vm691_vm5, %v3201_v54, %v3235_v63  ;;  %v751_v54 = vsel %vm691_vm5, %v3087_v6, %v3144_v29  ;;  %v848_v6 = vsel %vm151_vm1, %v3162_v33, %v3152_v30  ;;  %v3365_v29 = vld [vmem:[%s3889_s5 + $0x8] ss:$12 sps:$4 sm:$0xff]  }
 0x20a   :  { %1507 = vmatpush1.bf16.msra.mxu0 %v501_v49 }
 0x20b   :  { %1445 = vmatpush1.bf16.msra.mxu1 %v1029_v11  ;;  %1508 = vmatprep.subr.bf16.mxu0 %v559_v13  ;;  %v1211_v3 = vpop.permute.xlu1 %1210 }
 0x20c   :  { %v1271_v55 = vpop.permute.xlu0 %1270  ;;  %1446 = vmatprep.subr.bf16.mxu1 %v1087_v24  ;;  %v1223_v32 = vsel %vm1222_vm9, %v1211_v3, %v3255_v38 }
 0x20e   :  { %1509 = vmatpush1.bf16.msra.mxu0 %v558_v37  ;;  %v790_v37 = vsel %vm151_vm1, %v3209_v43, %v3247_v58  ;;  %v847_v43 = vsel %vm151_vm1, %v3107_v12, %v3162_v33 }
 0x20f   :  { %1447 = vmatpush1.bf16.msra.mxu1 %v1086_v39  ;;  %1510 = vmatprep.subr.bf16.mxu0 %v598_v42  ;;  %v3295_v57 = vpop.permute.xlu1 %1272  ;;  %v2694_v39 = vld [vmem:[%s3886_s1 + $0x14] ss:$28 sps:$4 sm:$0xff]  }
 0x210   :  { %v3299_v17 = vpop.permute.xlu0 %983  ;;  %1448 = vmatprep.subr.bf16.mxu1 %v1127_v59  ;;  %v1281_v11 = vsel %vm1222_vm9, %v1271_v55, %v3295_v57 }
 0x212   :  { %1511 = vmatpush1.bf16.msra.mxu0 %v597_v56 }
 0x213   :  { %1449 = vmatpush1.bf16.msra.mxu1 %v1126_v14  ;;  %1512 = vmatprep.subr.bf16.mxu0 %v655_v22  ;;  %v3308_v27 = vpop.permute.xlu1 %985 }
 0x214   :  { %v1269_v20 = vpop.permute.xlu0 %1268  ;;  %1450 = vmatprep.subr.bf16.mxu1 %v1184_v41  ;;  %v992_v14 = vsel %vm931_vm6, %v3299_v17, %v3308_v27 }
 0x216   :  { %1513 = vmatpush1.bf16.msra.mxu0 %v654_v47 }
 0x217   :  { %1451 = vmatpush1.bf16.msra.mxu1 %v1183_v48  ;;  %v3324_v16 = vpop.permute.xlu1 %687 }
 0x218   :  { %v555_v50 = vpop.permute.xlu0 %554  ;;  %1463 = vmatprep.subr.bf16.mxu1 %v1224_v26  ;;  %v695_v60 = vsel %vm691_vm5, %v3235_v63, %v3324_v16  ;;  %v1280_v63 = vsel %vm1222_vm9, %v1269_v20, %v1271_v55 }
 0x219   :  { %1514 = vmatprep.subr.bf16.mxu0 %v695_v60  ;;  %v560_v56 = vsel %vm267_vm3, %v3078_v2, %v555_v50 }
 0x21a   :  { %1453 = vmatmul.mubr.bf16.vlgmr.msra.gmra.mrb[8].mxu1 %v3322_v10  ;;  %1515 = vmatpush1.bf16.msra.mxu0 %v694_v21 }
 0x21b   :  { %1464 = vmatpush1.bf16.msra.mxu1 %v1223_v32  ;;  %1516 = vmatprep.subr.bf16.mxu0 %v752_v35  ;;  %v498_v49 = vpop.permute.xlu1 %497 }
 0x21c   :  { %v3343_v13 = vpop.permute.xlu0 %1082  ;;  %1465 = vmatprep.subr.bf16.mxu1 %v1281_v11  ;;  %1495 = vmatprep.mubr.bf16.mxu1 %v2708_v5 }
 0x21e   :  { %1517 = vmatpush1.bf16.msra.mxu0 %v751_v54 }
 0x21f   :  { %1466 = vmatpush1.bf16.msra.mxu1 %v1280_v63  ;;  %v3350_v38 = vpop.permute.xlu1 %784 }
 0x220   :  { %v594_v3 = vpop.permute.xlu0 %593  ;;  %2581 = vmatprep.subr.bf16.mxu1 %v3006_v51  ;;  %v791_v24 = vsel %vm151_vm1, %v3247_v58, %v3350_v38  ;;  %v503_v58 = vsel %vm267_vm3, %v3270_v52, %v498_v49 }
 0x221   :  { %1518 = vmatprep.subr.bf16.mxu0 %v791_v24 }
 0x222   :  { %1519 = vmatpush1.bf16.msra.mxu0 %v790_v37 }
 0x223   :  { %1520 = vmatprep.subr.bf16.mxu0 %v848_v6  ;;  %v1025_v51 = vpop.permute.xlu1 %1024 }
 0x224   :  { %v3367_v55 = vpop.permute.xlu0 %1121 }
 0x226   :  { %2568 = vmatmul.mubr.msk.bf16.vlgmr.msra.gmra.mrb[8].mxu1 %vm1416_vm10, %v3365_v29  ;;  %1521 = vmatpush1.bf16.msra.mxu0 %v847_v43 }
 0x227   :  { %2582 = vmatpush3.bf16.msra.mxu1 %v503_v58  ;;  %1522 = vmatprep.subr.bf16.mxu0 %v2998_v46  ;;  %v1081_v42 = vpop.permute.xlu1 %1080  ;;  %v599_v46 = vsel %vm209_vm2, %v3265_v18, %v594_v3 }
 0x228   :  { %v651_v59 = vpop.permute.xlu0 %650  ;;  %2583 = vmatprep.subr.bf16.mxu1 %v2694_v39  ;;  %1624 = vmatprep.mubr.bf16.mxu1 %v3063_v62 }
 0x22a   :  { %1523 = vmatpush1.bf16.msra.mxu0 %v2996_v44 }
 0x22b   :  { %2584 = vmatpush3.bf16.msra.mxu1 %v560_v56  ;;  %v930_v12 = vpop.permute.xlu1 %929  ;;  %1524 = vmatprep.subr.bf16.mxu0 %v3072_v0 }
 0x22c   :  { %v1023_v33 = vpop.permute.xlu0 %1022  ;;  %v936_v52 = vsel %vm931_vm6, %v3274_v45, %v930_v12 }
 0x22d   :  { %2585 = vmatprep.subr.bf16.mxu1 %v936_v52  ;;  %v1032_v41 = vsel %vm1028_vm7, %v1023_v33, %v1025_v51  ;;  %v1031_v47 = vsel %vm1028_vm7, %v3242_v36, %v1023_v33 }
 0x22e   :  { %1525 = vmatpush1.bf16.msra.mxu0 %v2892_v19 }
 0x22f   :  { %2586 = vmatpush3.bf16.msra.mxu1 %v599_v46  ;;  %v926_v62 = vpop.permute.xlu1 %925 }
 0x230   :  { %v934_v2 = vsel %vm931_vm6, %v3226_v53, %v926_v62  ;;  %v3392_v44 = vpop.permute.xlu0 %1179  ;;  %v935_v0 = vsel %vm931_vm6, %v926_v62, %v3274_v45  ;;  %v656_v53 = vsel %vm209_vm2, %v3095_v9, %v651_v59  ;;  %v991_v45 = vsel %vm931_vm6, %v3134_v23, %v3299_v17 }
 0x231   :  { %1526 = vmatprep.subr.bf16.mxu0 %v935_v0  ;;  %v1088_v23 = vsel %vm1028_vm7, %v3154_v31, %v1081_v42 }
 0x232   :  { %1527 = vmatpush1.bf16.msra.mxu0 %v934_v2 }
 0x233   :  { %1528 = vmatprep.subr.bf16.mxu0 %v992_v14  ;;  %v988_v18 = vpop.permute.xlu1 %987 }
 0x234   :  { %v690_v22 = vpop.permute.xlu0 %689  ;;  %v993_v19 = vsel %vm931_vm6, %v3308_v27, %v988_v18  ;;  %v1089_v27 = vsel %vm1028_vm7, %v1081_v42, %v3343_v13 }
 0x235   :  { %2587 = vmatprep.subr.bf16.mxu1 %v993_v19  ;;  %v696_v17 = vsel %vm691_vm5, %v3324_v16, %v690_v22 }
 0x236   :  { %1529 = vmatpush1.bf16.msra.mxu0 %v991_v45  ;;  %2588 = vmatpush3.bf16.msra.mxu1 %v656_v53 }
 0x237   :  { %1530 = vmatprep.subr.bf16.mxu0 %v1032_v41  ;;  %v1178_v20 = vpop.permute.xlu1 %1177 }
 0x238   :  { %v748_v48 = vpop.permute.xlu0 %747  ;;  %v1186_v32 = vsel %vm1125_vm8, %v1178_v20, %v3392_v44  ;;  %v1185_v35 = vsel %vm1125_vm8, %v3169_v34, %v1178_v20 }
 0x239   :  { %v753_v49 = vsel %vm691_vm5, %v3121_v15, %v748_v48 }
 0x23a   :  { %1531 = vmatpush1.bf16.msra.mxu0 %v1031_v47 }
 0x23b   :  { %1532 = vmatprep.subr.bf16.mxu0 %v1089_v27  ;;  %v1027_v9 = vpop.permute.xlu1 %1026 }
 0x23c   :  { %v1033_v26 = vsel %vm1028_vm7, %v1025_v51, %v1027_v9  ;;  %v1219_v36 = vpop.permute.xlu0 %1218 }
 0x23d   :  { %2589 = vmatprep.subr.bf16.mxu1 %v1033_v26 }
 0x23e   :  { %1533 = vmatpush1.bf16.msra.mxu0 %v1088_v23  ;;  %2590 = vmatpush3.bf16.msra.mxu1 %v696_v17 }
 0x23f   :  { %v1120_v50 = vpop.permute.xlu1 %1119 }
 0x240   :  { %v1128_v60 = vsel %vm1125_vm8, %v3251_v8, %v1120_v50  ;;  %v1129_v21 = vsel %vm1125_vm8, %v1120_v50, %v3367_v55  ;;  %v787_v8 = vpop.permute.xlu0 %786 }
 0x241   :  { %1534 = vmatprep.subr.bf16.mxu0 %v1129_v21  ;;  %v792_v63 = vsel %vm151_vm1, %v3350_v38, %v787_v8 }
 0x242   :  { %1535 = vmatpush1.bf16.msra.mxu0 %v1128_v60 }
 0x243   :  { %1536 = vmatprep.subr.bf16.mxu0 %v1186_v32  ;;  %v1085_v31 = vpop.permute.xlu1 %1084 }
 0x244   :  { %v1090_v16 = vsel %vm1028_vm7, %v3343_v13, %v1085_v31  ;;  %v1277_v13 = vpop.permute.xlu0 %1276 }
 0x245   :  { %2591 = vmatprep.subr.bf16.mxu1 %v1090_v16 }
 0x246   :  { %1537 = vmatpush1.bf16.msra.mxu0 %v1185_v35  ;;  %2592 = vmatpush3.bf16.msra.mxu1 %v753_v49 }
 0x247   :  { %v1124_v11 = vpop.permute.xlu1 %1123 }
 0x248   :  { %v1130_v54 = vsel %vm1125_vm8, %v3367_v55, %v1124_v11  ;;  %v844_v6 = vpop.permute.xlu0 %843 }
 0x249   :  { %1539 = vmatmul.mubr.bf16.vlgmr.msra.gmra.mrb[4].mxu0 %v3322_v10  ;;  %2593 = vmatprep.subr.bf16.mxu1 %v1130_v54 }
 0x24a   :  { %2594 = vmatpush3.bf16.msra.mxu1 %v792_v63  ;;  %1581 = vmatprep.mubr.bf16.mxu0 %v2708_v5 }
 0x24b   :  { %v1217_v34 = vpop.permute.xlu1 %1216 }
 0x24c   :  { %v1225_v15 = vsel %vm1222_vm9, %v3259_v61, %v1217_v34  ;;  %v1226_v3 = vsel %vm1222_vm9, %v1217_v34, %v1219_v36  ;;  %v849_v61 = vsel %vm151_vm1, %v3152_v30, %v844_v6  ;;  %v1279_v43 = vpop.permute.xlu0 %1278 }
 0x24d   :  { %1549 = vmatprep.subr.bf16.mxu0 %v1226_v3  ;;  %v1284_v58 = vsel %vm1222_vm9, %v1277_v13, %v1279_v43 }
 0x24e   :  { %1550 = vmatpush1.bf16.msra.mxu0 %v1225_v15 }
 0x24f   :  { %v1275_v24 = vpop.permute.xlu1 %1274 }
 0x250   :  { %v1282_v37 = vsel %vm1222_vm9, %v3295_v57, %v1275_v24  ;;  %v1283_v38 = vsel %vm1222_vm9, %v1275_v24, %v1277_v13 }
 0x251   :  { %1551 = vmatprep.subr.bf16.mxu0 %v1283_v38 }
 0x252   :  { %1552 = vmatpush1.bf16.msra.mxu0 %v1282_v37 }
 0x253   :  { %v1182_v51 = vpop.permute.xlu1 %1181  ;;  %2618 = vmatprep.subr.bf16.mxu0 %v2710_v7 }
 0x254   :  { %v1187_v55 = vsel %vm1125_vm8, %v3392_v44, %v1182_v51 }
 0x255   :  { %2569 = vmatmul.mubr.msk.bf16.vlgmr.msra.gmra.mrb[4].mxu0 %vm1416_vm10, %v3365_v29  ;;  %2595 = vmatprep.subr.bf16.mxu1 %v1187_v55 }
 0x256   :  { %2596 = vmatpush3.bf16.msra.mxu1 %v849_v61  ;;  %2622 = vmatprep.mubr.msk.bf16.mxu0 %vm2711_vm0, %v2710_v7 }
 0x257   :  { %v1221_v57 = vpop.permute.xlu1 %1220 }
 0x258   :  { %v1227_v39 = vsel %vm1222_vm9, %v1219_v36, %v1221_v57 }
 0x259   :  { %1625 = vmatmul.mubr.bf16.vlgmr.msra.gmra.mrb[12].mxu1 %v3322_v10  ;;  %2619 = vmatpush3.bf16.msra.mxu0 %v1227_v39 }
 0x25a   :  { %2620 = vmatprep.subr.bf16.mxu0 %v2710_v7 }
 0x25d   :  { %2621 = vmatpush3.bf16.msra.mxu0 %v1284_v58  ;;  %v1399_v33 = vpop.permute.xlu0 %1398 }
 0x260   :  { %2623 = vmatmul.mubr.msk.bf16.vlgmr.msra.gmra.mrb[8].mxu0 %vm1416_vm10, %v3365_v29 }
 0x268   :  { %v1394_v12 = vpop.permute.xlu1 %1393 }
 0x2f9   :  { %v1497_v30 = vpop.f32.mrb[8].mxu1 }
 0x2fa   :  { %v1499_v42 = vpop.f32.mrb[9].mxu1  ;;  %v2626_v52 = vadd.f32 %v1497_v30, %v1394_v12 }
 0x2fb   :  { %v1501_v59 = vpop.f32.mrb[10].mxu1  ;;  %v2627_v46 = vadd.f32 %v1499_v42, %v1394_v12 }
 0x2fc   :  { %v1503_v56 = vpop.f32.mrb[11].mxu1  ;;  %v2628_v62 = vadd.f32 %v1501_v59, %v1399_v33  ;;  %v1674_v10 = vmax.f32 %v2626_v52, 0.0 }
 0x2fd   :  { %v2629_v2 = vadd.f32 %v1503_v56, %v1399_v33  ;;  %v1675_v0 = vmax.f32 %v2627_v46, 0.0 }
 0x2fe   :  { %v1679_v7 = vmax.f32 %v2628_v62, 0.0  ;;  %v3456_v20 = vmul.f32 %v1674_v10, %v2954_v1 }
 0x2ff   :  { %v1680_v14 = vmax.f32 %v2629_v2, 0.0  ;;  %v3459_v27 = vmul.f32 %v1675_v0, %v2956_v4 }
 0x300   :  { %v3462_v9 = vmul.f32 %v1679_v7, %v2954_v1  ;;  %v1708_v54 = vmul.f32 %v3456_v20, %v3456_v20 }
 0x301   :  { %v3465_v26 = vmul.f32 %v1680_v14, %v2956_v4  ;;  %v1694_v49 = vadd.f32 %v3459_v27, %v3456_v20  ;;  %v1709_v34 = vmul.f32 %v3459_v27, %v3459_v27 }
 0x302   :  { %v1713_v8 = vmul.f32 %v3462_v9, %v3462_v9 }
 0x303   :  { %v1714_v11 = vmul.f32 %v3465_v26, %v3465_v26  ;;  %v1700_v13 = vadd.f32 %v3465_v26, %v3462_v9  ;;  %v1718_v59 = vadd.f32 %v1709_v34, %v1708_v54 }
 0x305   :  { %v1724_v61 = vadd.f32 %v1714_v11, %v1713_v8  ;;  %v1733_v11 = vld [vmem:[%s3891_s7 + $0x8] sm:$0xff] }
 0x328   :  { %v1583_v44 = vpop.f32.mrb[4].mxu0 }
 0x329   :  { %v2630_v18 = vadd.f32 %v1583_v44, %v1394_v12  ;;  %v1585_v22 = vpop.f32.mrb[5].mxu0 }
 0x32a   :  { %v1587_v19 = vpop.f32.mrb[6].mxu0  ;;  %v2631_v29 = vadd.f32 %v1585_v22, %v1394_v12 }
 0x32b   :  { %v1676_v53 = vmax.f32 %v2630_v18, 0.0  ;;  %v2632_v45 = vadd.f32 %v1587_v19, %v1399_v33  ;;  %v1589_v41 = vpop.f32.mrb[7].mxu0 }
 0x32c   :  { %v2633_v47 = vadd.f32 %v1589_v41, %v1399_v33  ;;  %v2597_v48 = vpop.f32.mrb[12].mxu1  ;;  %v1677_v21 = vmax.f32 %v2631_v29, 0.0 }
 0x32d   :  { %v1681_v23 = vmax.f32 %v2632_v45, 0.0  ;;  %v2598_v17 = vpop.f32.mrb[13].mxu1  ;;  %v3468_v60 = vmul.f32 %v1676_v53, %v2976_v25 }
 0x32e   :  { %v2599_v50 = vadd.f32 %v2598_v17, %v2597_v48  ;;  %v2600_v36 = vpop.f32.mrb[14].mxu1  ;;  %v1682_v16 = vmax.f32 %v2633_v47, 0.0  ;;  %v3487_v3 = vmul.f32 %v1677_v21, %v2980_v28 }
 0x32f   :  { %v2601_v32 = vpop.f32.mrb[15].mxu1  ;;  %v3471_v31 = vmul.f32 %v1681_v23, %v2976_v25  ;;  %v1695_v15 = vadd.f32 %v1694_v49, %v3468_v60  ;;  %v1710_v39 = vmul.f32 %v3468_v60, %v3468_v60 }
 0x330   :  { %v2602_v35 = vadd.f32 %v2601_v32, %v2600_v36  ;;  %v1627_v63 = vadd.f32 %v2599_v50, %v1394_v12  ;;  %v3492_v38 = vmul.f32 %v1682_v16, %v2980_v28  ;;  %v1711_v62 = vmul.f32 %v3487_v3, %v3487_v3 }
 0x331   :  { %v1715_v37 = vmul.f32 %v3471_v31, %v3471_v31  ;;  %v1701_v43 = vadd.f32 %v1700_v13, %v3471_v31  ;;  %v1696_v56 = vadd.f32 %v1695_v15, %v3487_v3  ;;  %v1719_v0 = vadd.f32 %v1718_v59, %v1710_v39 }
 0x332   :  { %v1630_v55 = vadd.f32 %v2602_v35, %v1399_v33  ;;  %v1716_v12 = vmul.f32 %v3492_v38, %v3492_v38 }
 0x333   :  { %v1667_v24 = vpop.f32.mrb[8].mxu0  ;;  %v1725_v46 = vadd.f32 %v1724_v61, %v1715_v37  ;;  %v1702_v44 = vadd.f32 %v1701_v43, %v3492_v38  ;;  %v1720_v53 = vadd.f32 %v1719_v0, %v1711_v62  ;;  %v1775_v37 = vld [vmem:[%s3892_s8 + $0x8] sm:$0xff] }
 0x334   :  { %v1668_v6 = vadd.f32 %v1667_v24, %v1627_v63  ;;  %v2624_v51 = vpop.f32.mrb[9].mxu0  ;;  %v1732_v63 = vld [vmem:[%s3891_s7] sm:$0xff] }
 0x335   :  { %v1670_v57 = vpop.f32.mrb[10].mxu0  ;;  %v1726_v18 = vadd.f32 %v1725_v46, %v1716_v12  ;;  %v1774_v24 = vld [vmem:[%s3892_s8] sm:$0xff] }
 0x336   :  { %v1678_v58 = vmax.f32 %v1668_v6, 0.0  ;;  %v1671_v30 = vadd.f32 %v1670_v57, %v1630_v55  ;;  %v2625_v42 = vpop.f32.mrb[11].mxu0 }
 0x338   :  { %v3501_v52 = vmul.f32 %v1678_v58, %v2990_v40  ;;  %v1683_v33 = vmax.f32 %v1671_v30, 0.0 }
 0x33a   :  { %v3506_v2 = vmul.f32 %v1683_v33, %v2990_v40  ;;  %v1697_v10 = vadd.f32 %v1696_v56, %v3501_v52  ;;  %v1712_v22 = vmul.f32 %v3501_v52, %v3501_v52 }
 0x33c   :  { %1698 = vadd.xlane.f32.xlu1 %v1697_v10  ;;  %v1703_v7 = vadd.f32 %v1702_v44, %v3506_v2  ;;  %v1717_v14 = vmul.f32 %v3506_v2, %v3506_v2  ;;  %v1721_v29 = vadd.f32 %v1720_v53, %v1712_v22 }
 0x33e   :  { %1704 = vadd.xlane.f32.xlu0 %v1703_v7  ;;  %v1727_v19 = vadd.f32 %v1726_v18, %v1717_v14 }
 0x340   :  { %1728 = vadd.xlane.f32.xlu1 %v1727_v19 }
 0x342   :  { %1722 = vadd.xlane.f32.xlu0 %v1721_v29 }
 0x3c9   :  { %v1699_v45 = vpop.xlane.xlu1 %1698 }
 0x3ca   :  { %v1706_v47 = vmul.f32 0.001953125, %v1699_v45 }
 0x3cb   :  { %v1705_v41 = vpop.xlane.xlu0 %1704 }
 0x3cc   :  { %v1707_v48 = vmul.f32 0.001953125, %v1705_v41  ;;  %v1734_v16 = vmul.f32 %v1706_v47, %v1706_v47  ;;  %v1744_v51 = vsub.f32 %v3456_v20, %v1706_v47  ;;  %v1745_v55 = vsub.f32 %v3459_v27, %v1706_v47 }
 0x3cd   :  { %v1729_v23 = vpop.xlane.xlu1 %1728  ;;  %v1746_v61 = vsub.f32 %v3468_v60, %v1706_v47  ;;  %v1747_v57 = vsub.f32 %v3487_v3, %v1706_v47  ;;  %v1748_v39 = vsub.f32 %v3501_v52, %v1706_v47 }
 0x3ce   :  { %v1735_v17 = vmul.f32 %v1707_v48, %v1707_v48  ;;  %v1731_v50 = vmul.f32 0.001953125, %v1729_v23  ;;  %v1749_v56 = vsub.f32 %v3462_v9, %v1707_v48  ;;  %v1750_v12 = vsub.f32 %v3465_v26, %v1707_v48 }
 0x3cf   :  { %v1723_v36 = vpop.xlane.xlu0 %1722  ;;  %v1751_v33 = vsub.f32 %v3471_v31, %v1707_v48  ;;  %v1752_v27 = vsub.f32 %v3492_v38, %v1707_v48  ;;  %v1753_v60 = vsub.f32 %v3506_v2, %v1707_v48 }
 0x3d0   :  { %v1737_v21 = vsub.f32 %v1731_v50, %v1735_v17  ;;  %v1730_v32 = vmul.f32 0.001953125, %v1723_v36 }
 0x3d2   :  { %v1739_v35 = vadd.f32 1e-05, %v1737_v21  ;;  %v1736_v49 = vsub.f32 %v1730_v32, %v1734_v16 }
 0x3d4   :  { %2698 = vrsqrt.f32 %v1739_v35  ;;  %v1738_v8 = vadd.f32 1e-05, %v1736_v49 }
 0x3d6   :  { %2700 = vrsqrt.f32 %v1738_v8  ;;  %v3604_v8 = vld [vmem:[%s3893_s9 + $0x4] ss:$8 sps:$4 sm:$0xff]  }
 0x3d7   :  { %2573 = vmatprep.mubr.msk.bf16.mxu0 %vm2208_vm11, %v3604_v8  ;;  %2574 = vmatprep.mubr.msk.bf16.mxu1 %vm2208_vm11, %v3604_v8 }
 0x3de   :  { %v2699_v54 = vpop.eup %2698 }
 0x3df   :  { %v1743_v34 = vmul.f32 %v2699_v54, %v1733_v11  ;;  %v2188_v11 = vld [vmem:[%s3894_s10 + $0x8] sm:$0xff]  ;;  %v2187_v54 = vld [vmem:[%s3894_s10] sm:$0xff] }
 0x3e0   :  { %v2701_v13 = vpop.eup %2700 }
 0x3e1   :  { %1761 = vperm.xlu1 %2654, %v1743_v34   ;;  %v1742_v15 = vmul.f32 %v2701_v13, %v1732_v63 }
 0x3e3   :  { %1756 = vperm.xlu0 %2653, %v1742_v15  }
 0x3e5   :  { %1778 = vperm.xlu1 %2654, %v1774_v24  }
 0x3e7   :  { %1783 = vperm.xlu0 %2653, %v1775_v37  }
 0x3e9   :  { %1830 = vrot.lane.b32.xlu1 %v2708_v5, %s2709_s22 }
 0x3eb   :  { %1869 = vrot.lane.b32.xlu0 %v2708_v5, %s2707_s19 }
 0x3ed   :  { %1908 = vrot.lane.b32.xlu1 %v2708_v5, %s2712_s4 }
 0x3ef   :  { %1947 = vrot.lane.b32.xlu0 %v2708_v5, %s2706_s29 }
 0x3f1   :  { %2006 = vrot.lane.b32.xlu1 %v2708_v5, %s2713_s17 }
 0x3f3   :  { %2045 = vrot.lane.b32.xlu0 %v2708_v5, %s2714_s21 }
 0x460   :  { %v1762_v6 = vpop.permute.xlu1 %1761 }
 0x461   :  { %v1769_v52 = vmul.f32 %v1762_v6, %v1749_v56  ;;  %v1770_v10 = vmul.f32 %v1762_v6, %v1750_v12  ;;  %v1771_v44 = vmul.f32 %v1762_v6, %v1751_v33  ;;  %v1772_v14 = vmul.f32 %v1762_v6, %v1752_v27 }
 0x462   :  { %v1757_v43 = vpop.permute.xlu0 %1756  ;;  %v1773_v18 = vmul.f32 %v1762_v6, %v1753_v60 }
 0x463   :  { %v1764_v58 = vmul.f32 %v1757_v43, %v1744_v51  ;;  %v1765_v30 = vmul.f32 %v1757_v43, %v1745_v55  ;;  %v1766_v42 = vmul.f32 %v1757_v43, %v1746_v61  ;;  %v1767_v59 = vmul.f32 %v1757_v43, %v1747_v57 }
 0x464   :  { %v1768_v20 = vmul.f32 %v1757_v43, %v1748_v39  ;;  %v1779_v46 = vpop.permute.xlu1 %1778 }
 0x465   :  { %v1786_v3 = vadd.f32 %v1779_v46, %v1764_v58  ;;  %v1787_v62 = vadd.f32 %v1779_v46, %v1765_v30  ;;  %v1788_v0 = vadd.f32 %v1779_v46, %v1766_v42  ;;  %v1789_v9 = vadd.f32 %v1779_v46, %v1767_v59 }
 0x466   :  { %v1784_v7 = vpop.permute.xlu0 %1783  ;;  %v1790_v22 = vadd.f32 %v1779_v46, %v1768_v20 }
 0x467   :  { %v1791_v26 = vadd.f32 %v1784_v7, %v1769_v52  ;;  %v1792_v19 = vadd.f32 %v1784_v7, %v1770_v10  ;;  %v1793_v31 = vadd.f32 %v1784_v7, %v1771_v44  ;;  %v1796_v53 = vmul.f32 %v1786_v3, %v2954_v1 }
 0x468   :  { %v1797_v38 = vmul.f32 %v1787_v62, %v2956_v4  ;;  %v1794_v29 = vadd.f32 %v1784_v7, %v1772_v14  ;;  %v1795_v2 = vadd.f32 %v1784_v7, %v1773_v18  ;;  %v1798_v45 = vmul.f32 %v1788_v0, %v2976_v25  ;;  %v1831_v34 = vpop.permute.xlu1 %1830 }
 0x469   :  { %v1801_v41 = vmul.f32 %v1791_v26, %v2954_v1  ;;  %v1802_v47 = vmul.f32 %v1792_v19, %v2956_v4  ;;  %v1803_v48 = vmul.f32 %v1793_v31, %v2976_v25  ;;  %v1799_v23 = vmul.f32 %v1789_v9, %v2980_v28 }
 0x46a   :  { %v1800_v17 = vmul.f32 %v1790_v22, %v2990_v40  ;;  %v1804_v50 = vmul.f32 %v1794_v29, %v2980_v28  ;;  %v1805_v36 = vmul.f32 %v1795_v2, %v2990_v40  ;;  %v1870_v63 = vpop.permute.xlu0 %1869 }
 0x46b   :  { %v3559_v21 = vpack.c.bf16 %v1801_v41, %v1796_v53  ;;  %v3561_v32 = vpack.c.bf16 %v1802_v47, %v1797_v38  ;;  %v3563_v16 = vpack.c.bf16 %v1803_v48, %v1798_v45 }
 0x46c   :  { %v3565_v35 = vpack.c.bf16 %v1804_v50, %v1799_v23  ;;  %v3567_v49 = vpack.c.bf16 %v1805_v36, %v1800_v17  ;;  %v1909_v15 = vpop.permute.xlu1 %1908  ;;  %v3713_v23 = vld [vmem:[%s3893_s9] ss:$8 sps:$4 sm:$0xff]  }
 0x46d   :  { %1834 = vrot.lane.b32.xlu0 %v3561_v32, %s2709_s22  ;;  %1832 = vrot.lane.b32.xlu1 %v3559_v21, %s2709_s22 }
 0x46e   :  { %v1948_v13 = vpop.permute.xlu0 %1947 }
 0x470   :  { %v3670_v37 = vpop.permute.xlu1 %2006 }
 0x471   :  { %1871 = vrot.lane.b32.xlu0 %v3559_v21, %s2707_s19  ;;  %1873 = vrot.lane.b32.xlu1 %v3561_v32, %s2707_s19 }
 0x472   :  { %v3668_v24 = vpop.permute.xlu0 %2045 }
 0x475   :  { %1912 = vrot.lane.b32.xlu0 %v3561_v32, %s2712_s4  ;;  %1910 = vrot.lane.b32.xlu1 %v3559_v21, %s2712_s4 }
 0x479   :  { %1949 = vrot.lane.b32.xlu0 %v3559_v21, %s2706_s29  ;;  %1951 = vrot.lane.b32.xlu1 %v3561_v32, %s2706_s29 }
 0x47d   :  { %2000 = vrot.lane.b32.xlu0 %v3563_v16, %s2713_s17  ;;  %1998 = vrot.lane.b32.xlu1 %v3561_v32, %s2713_s17 }
 0x481   :  { %2037 = vrot.lane.b32.xlu0 %v3561_v32, %s2714_s21  ;;  %1996 = vrot.lane.b32.xlu1 %v3559_v21, %s2713_s17 }
 0x485   :  { %2035 = vrot.lane.b32.xlu0 %v3559_v21, %s2714_s21  ;;  %2039 = vrot.lane.b32.xlu1 %v3563_v16, %s2714_s21 }
 0x489   :  { %2078 = vrot.lane.b32.xlu0 %v3563_v16, %s2715_s0  ;;  %2076 = vrot.lane.b32.xlu1 %v3561_v32, %s2715_s0 }
 0x48d   :  { %1836 = vrot.lane.b32.xlu0 %v3563_v16, %s2709_s22  ;;  %2074 = vrot.lane.b32.xlu1 %v3559_v21, %s2715_s0 }
 0x491   :  { %2115 = vrot.lane.b32.xlu0 %v3561_v32, %s2716_s2  ;;  %1838 = vrot.lane.b32.xlu1 %v3565_v35, %s2709_s22 }
 0x495   :  { %2113 = vrot.lane.b32.xlu0 %v3559_v21, %s2716_s2  ;;  %2117 = vrot.lane.b32.xlu1 %v3563_v16, %s2716_s2 }
 0x499   :  { %1877 = vrot.lane.b32.xlu0 %v3565_v35, %s2707_s19  ;;  %1875 = vrot.lane.b32.xlu1 %v3563_v16, %s2707_s19 }
 0x49d   :  { %1914 = vrot.lane.b32.xlu0 %v3563_v16, %s2712_s4  ;;  %1840 = vrot.lane.b32.xlu1 %v3567_v49, %s2709_s22 }
 0x4a1   :  { %1879 = vrot.lane.b32.xlu0 %v3567_v49, %s2707_s19  ;;  %1916 = vrot.lane.b32.xlu1 %v3565_v35, %s2712_s4 }
 0x4a5   :  { %1955 = vrot.lane.b32.xlu0 %v3565_v35, %s2706_s29  ;;  %1953 = vrot.lane.b32.xlu1 %v3563_v16, %s2706_s29 }
 0x4a9   :  { %1957 = vrot.lane.b32.xlu0 %v3567_v49, %s2706_s29  ;;  %1918 = vrot.lane.b32.xlu1 %v3567_v49, %s2712_s4 }
 0x4ad   :  { %2004 = vrot.lane.b32.xlu0 %v3567_v49, %s2713_s17  ;;  %2002 = vrot.lane.b32.xlu1 %v3565_v35, %s2713_s17 }
 0x4b1   :  { %2043 = vrot.lane.b32.xlu0 %v3567_v49, %s2714_s21  ;;  %2041 = vrot.lane.b32.xlu1 %v3565_v35, %s2714_s21 }
 0x4b5   :  { %2080 = vrot.lane.b32.xlu0 %v3565_v35, %s2715_s0  ;;  %2082 = vrot.lane.b32.xlu1 %v3567_v49, %s2715_s0 }
 0x4b9   :  { %2121 = vrot.lane.b32.xlu0 %v3567_v49, %s2716_s2  ;;  %2119 = vrot.lane.b32.xlu1 %v3565_v35, %s2716_s2 }
 0x4bd   :  { %2123 = vrot.lane.b32.xlu0 %v2708_v5, %s2716_s2  ;;  %2084 = vrot.lane.b32.xlu1 %v2708_v5, %s2715_s0 }
 0x4c1   :  { %2196 = vperm.xlu0 %2653, %v2188_v11   ;;  %2191 = vperm.xlu1 %2654, %v2187_v54  }
 0x4df   :  { %v1835_v6 = vpop.permute.xlu0 %1834  ;;  %v1833_v51 = vpop.permute.xlu1 %1832 }
 0x4e0   :  { %v1842_v55 = vsel %vm267_vm3, %v1831_v34, %v1833_v51  ;;  %v1843_v61 = vsel %vm267_vm3, %v1833_v51, %v1835_v6 }
 0x4e1   :  { %2212 = vmatprep.subr.bf16.mxu0 %v1843_v61 }
 0x4e2   :  { %2213 = vmatpush1.bf16.msra.mxu0 %v1842_v55 }
 0x4e3   :  { %v1872_v57 = vpop.permute.xlu0 %1871  ;;  %v1874_v39 = vpop.permute.xlu1 %1873 }
 0x4e4   :  { %v1881_v43 = vsel %vm209_vm2, %v1870_v63, %v1872_v57  ;;  %v1882_v58 = vsel %vm209_vm2, %v1872_v57, %v1874_v39 }
 0x4e5   :  { %2214 = vmatprep.subr.bf16.mxu0 %v1882_v58 }
 0x4e6   :  { %2215 = vmatpush1.bf16.msra.mxu0 %v1881_v43 }
 0x4e7   :  { %v3676_v30 = vpop.permute.xlu0 %1912  ;;  %v1911_v42 = vpop.permute.xlu1 %1910 }
 0x4e8   :  { %v1920_v59 = vsel %vm691_vm5, %v1909_v15, %v1911_v42  ;;  %v1921_v56 = vsel %vm691_vm5, %v1911_v42, %v3676_v30 }
 0x4e9   :  { %2216 = vmatprep.subr.bf16.mxu0 %v1921_v56 }
 0x4ea   :  { %2217 = vmatpush1.bf16.msra.mxu0 %v1920_v59 }
 0x4eb   :  { %v1950_v12 = vpop.permute.xlu0 %1949  ;;  %v3681_v33 = vpop.permute.xlu1 %1951 }
 0x4ec   :  { %v1959_v20 = vsel %vm151_vm1, %v1948_v13, %v1950_v12  ;;  %v1960_v46 = vsel %vm151_vm1, %v1950_v12, %v3681_v33 }
 0x4ed   :  { %2218 = vmatprep.subr.bf16.mxu0 %v1960_v46 }
 0x4ee   :  { %2219 = vmatpush1.bf16.msra.mxu0 %v1959_v20 }
 0x4ef   :  { %v3686_v27 = vpop.permute.xlu0 %2000  ;;  %2220 = vmatprep.subr.bf16.mxu0 %v3561_v32  ;;  %v1999_v60 = vpop.permute.xlu1 %1998 }
 0x4f0   :  { %v2009_v3 = vsel %vm931_vm6, %v1999_v60, %v3686_v27 }
 0x4f2   :  { %2221 = vmatpush1.bf16.msra.mxu0 %v3559_v21 }
 0x4f3   :  { %v2038_v62 = vpop.permute.xlu0 %2037  ;;  %2222 = vmatprep.subr.bf16.mxu0 %v2009_v3  ;;  %v1997_v52 = vpop.permute.xlu1 %1996 }
 0x4f4   :  { %v2008_v10 = vsel %vm931_vm6, %v1997_v52, %v1999_v60 }
 0x4f6   :  { %2223 = vmatpush1.bf16.msra.mxu0 %v2008_v10 }
 0x4f7   :  { %v2036_v44 = vpop.permute.xlu0 %2035  ;;  %v3693_v0 = vpop.permute.xlu1 %2039 }
 0x4f8   :  { %v2047_v7 = vsel %vm1028_vm7, %v2036_v44, %v2038_v62  ;;  %v2048_v14 = vsel %vm1028_vm7, %v2038_v62, %v3693_v0 }
 0x4f9   :  { %2224 = vmatprep.subr.bf16.mxu0 %v2048_v14 }
 0x4fa   :  { %2225 = vmatpush1.bf16.msra.mxu0 %v2047_v7 }
 0x4fb   :  { %v3698_v18 = vpop.permute.xlu0 %2078  ;;  %v2077_v9 = vpop.permute.xlu1 %2076 }
 0x4fc   :  { %v2087_v22 = vsel %vm1125_vm8, %v2077_v9, %v3698_v18 }
 0x4fd   :  { %2226 = vmatprep.subr.bf16.mxu0 %v2087_v22 }
 0x4ff   :  { %v1837_v26 = vpop.permute.xlu0 %1836  ;;  %v2075_v19 = vpop.permute.xlu1 %2074 }
 0x500   :  { %v2086_v31 = vsel %vm1125_vm8, %v2075_v19, %v2077_v9  ;;  %v1844_v2 = vsel %vm267_vm3, %v1835_v6, %v1837_v26 }
 0x501   :  { %2227 = vmatpush1.bf16.msra.mxu0 %v2086_v31 }
 0x503   :  { %v2116_v53 = vpop.permute.xlu0 %2115  ;;  %v1839_v38 = vpop.permute.xlu1 %1838 }
 0x504   :  { %v1845_v29 = vsel %vm267_vm3, %v1837_v26, %v1839_v38 }
 0x505   :  { %2255 = vmatprep.subr.bf16.mxu1 %v1845_v29 }
 0x506   :  { %2256 = vmatpush1.bf16.msra.mxu1 %v1844_v2 }
 0x507   :  { %v2114_v45 = vpop.permute.xlu0 %2113  ;;  %v3705_v41 = vpop.permute.xlu1 %2117 }
 0x508   :  { %v2125_v47 = vsel %vm1222_vm9, %v2114_v45, %v2116_v53  ;;  %v2126_v48 = vsel %vm1222_vm9, %v2116_v53, %v3705_v41 }
 0x509   :  { %2228 = vmatprep.subr.bf16.mxu0 %v2126_v48 }
 0x50a   :  { %2229 = vmatpush1.bf16.msra.mxu0 %v2125_v47 }
 0x50b   :  { %v1878_v17 = vpop.permute.xlu0 %1877  ;;  %v1876_v50 = vpop.permute.xlu1 %1875  ;;  %2298 = vmatprep.subr.bf16.mxu0 %v2708_v5 }
 0x50c   :  { %v1883_v36 = vsel %vm209_vm2, %v1874_v39, %v1876_v50  ;;  %v1884_v21 = vsel %vm209_vm2, %v1876_v50, %v1878_v17 }
 0x50d   :  { %2245 = vmatmul.mubr.bf16.vlgmr.msra.gmra.mrb[12].mxu0 %v3713_v23  ;;  %2257 = vmatprep.subr.bf16.mxu1 %v1884_v21 }
 0x50e   :  { %2258 = vmatpush1.bf16.msra.mxu1 %v1883_v36  ;;  %2575 = vmatprep.mubr.msk.bf16.mxu0 %vm2208_vm11, %v3604_v8 }
 0x50f   :  { %v1915_v32 = vpop.permute.xlu0 %1914  ;;  %v1841_v11 = vpop.permute.xlu1 %1840 }
 0x510   :  { %v1846_v54 = vsel %vm267_vm3, %v1839_v38, %v1841_v11  ;;  %v1922_v6 = vsel %vm691_vm5, %v3676_v30, %v1915_v32 }
 0x511   :  { %2299 = vmatpush1.bf16.msra.mxu0 %v1846_v54 }
 0x512   :  { %2300 = vmatprep.subr.bf16.mxu0 %v2708_v5 }
 0x513   :  { %v1880_v63 = vpop.permute.xlu0 %1879  ;;  %v1917_v34 = vpop.permute.xlu1 %1916 }
 0x514   :  { %v1885_v13 = vsel %vm209_vm2, %v1878_v17, %v1880_v63  ;;  %v1923_v15 = vsel %vm691_vm5, %v1915_v32, %v1917_v34 }
 0x515   :  { %2259 = vmatprep.subr.bf16.mxu1 %v1923_v15  ;;  %2301 = vmatpush1.bf16.msra.mxu0 %v1885_v13 }
 0x516   :  { %2260 = vmatpush1.bf16.msra.mxu1 %v1922_v6  ;;  %2302 = vmatprep.subr.bf16.mxu0 %v2708_v5 }
 0x517   :  { %v1956_v8 = vpop.permute.xlu0 %1955  ;;  %v1954_v51 = vpop.permute.xlu1 %1953 }
 0x518   :  { %v1961_v55 = vsel %vm151_vm1, %v3681_v33, %v1954_v51  ;;  %v1962_v61 = vsel %vm151_vm1, %v1954_v51, %v1956_v8 }
 0x519   :  { %2261 = vmatprep.subr.bf16.mxu1 %v1962_v61 }
 0x51a   :  { %2262 = vmatpush1.bf16.msra.mxu1 %v1961_v55 }
 0x51b   :  { %v1958_v57 = vpop.permute.xlu0 %1957  ;;  %2263 = vmatprep.subr.bf16.mxu1 %v3565_v35  ;;  %v1919_v39 = vpop.permute.xlu1 %1918 }
 0x51c   :  { %v1924_v43 = vsel %vm691_vm5, %v1917_v34, %v1919_v39  ;;  %v1963_v42 = vsel %vm151_vm1, %v1956_v8, %v1958_v57 }
 0x51d   :  { %2303 = vmatpush1.bf16.msra.mxu0 %v1924_v43 }
 0x51e   :  { %2264 = vmatpush1.bf16.msra.mxu1 %v3563_v16  ;;  %2304 = vmatprep.subr.bf16.mxu0 %v2708_v5 }
 0x51f   :  { %v2005_v58 = vpop.permute.xlu0 %2004  ;;  %v2003_v30 = vpop.permute.xlu1 %2002 }
 0x520   :  { %v2010_v59 = vsel %vm931_vm6, %v3686_v27, %v2003_v30  ;;  %v2011_v56 = vsel %vm931_vm6, %v2003_v30, %v2005_v58  ;;  %v2012_v27 = vsel %vm931_vm6, %v2005_v58, %v3670_v37 }
 0x521   :  { %2265 = vmatprep.subr.bf16.mxu1 %v2011_v56  ;;  %2305 = vmatpush1.bf16.msra.mxu0 %v1963_v42 }
 0x522   :  { %2266 = vmatpush1.bf16.msra.mxu1 %v2010_v59  ;;  %2306 = vmatprep.subr.bf16.mxu0 %v2708_v5 }
 0x523   :  { %v2044_v35 = vpop.permute.xlu0 %2043  ;;  %v2042_v12 = vpop.permute.xlu1 %2041 }
 0x524   :  { %v2049_v16 = vsel %vm1028_vm7, %v3693_v0, %v2042_v12  ;;  %v2050_v33 = vsel %vm1028_vm7, %v2042_v12, %v2044_v35  ;;  %v2051_v52 = vsel %vm1028_vm7, %v2044_v35, %v3668_v24 }
 0x525   :  { %2267 = vmatprep.subr.bf16.mxu1 %v2050_v33  ;;  %2307 = vmatpush1.bf16.msra.mxu0 %v3567_v49 }
 0x526   :  { %2268 = vmatpush1.bf16.msra.mxu1 %v2049_v16  ;;  %2308 = vmatprep.subr.bf16.mxu0 %v2708_v5 }
 0x527   :  { %v2081_v20 = vpop.permute.xlu0 %2080  ;;  %v2083_v46 = vpop.permute.xlu1 %2082 }
 0x528   :  { %v2088_v60 = vsel %vm1125_vm8, %v3698_v18, %v2081_v20  ;;  %v2089_v3 = vsel %vm1125_vm8, %v2081_v20, %v2083_v46 }
 0x529   :  { %2269 = vmatprep.subr.bf16.mxu1 %v2089_v3  ;;  %2309 = vmatpush1.bf16.msra.mxu0 %v2012_v27 }
 0x52a   :  { %2270 = vmatpush1.bf16.msra.mxu1 %v2088_v60  ;;  %2310 = vmatprep.subr.bf16.mxu0 %v2708_v5 }
 0x52b   :  { %v2122_v62 = vpop.permute.xlu0 %2121  ;;  %v2120_v49 = vpop.permute.xlu1 %2119 }
 0x52c   :  { %v2127_v10 = vsel %vm1222_vm9, %v3705_v41, %v2120_v49  ;;  %v2128_v37 = vsel %vm1222_vm9, %v2120_v49, %v2122_v62 }
 0x52d   :  { %2271 = vmatprep.subr.bf16.mxu1 %v2128_v37  ;;  %2311 = vmatpush1.bf16.msra.mxu0 %v2051_v52 }
 0x52e   :  { %2272 = vmatpush1.bf16.msra.mxu1 %v2127_v10  ;;  %2312 = vmatprep.subr.bf16.mxu0 %v2708_v5 }
 0x52f   :  { %v2085_v44 = vpop.permute.xlu1 %2084  ;;  %v2124_v7 = vpop.permute.xlu0 %2123 }
 0x530   :  { %v2090_v0 = vsel %vm1125_vm8, %v2083_v46, %v2085_v44  ;;  %v2129_v24 = vsel %vm1222_vm9, %v2122_v62, %v2124_v7 }
 0x531   :  { %2288 = vmatmul.mubr.bf16.vlgmr.msra.gmra.mrb[16].mxu1 %v3713_v23  ;;  %2313 = vmatpush1.bf16.msra.mxu0 %v2090_v0 }
 0x532   :  { %2314 = vmatprep.subr.bf16.mxu0 %v2708_v5 }
 0x535   :  { %2315 = vmatpush1.bf16.msra.mxu0 %v2129_v24 }
 0x538   :  { %2331 = vmatmul.mubr.bf16.vlgmr.msra.gmra.mrb[16].mxu0 %v3713_v23 }
 0x540   :  { %v2192_v26 = vpop.permute.xlu1 %2191  ;;  %v2197_v19 = vpop.permute.xlu0 %2196 }
 0x5e0   :  { %v2246_v14 = vpop.f32.mrb[12].mxu0 }
 0x5e1   :  { %v2248_v18 = vpop.f32.mrb[13].mxu0  ;;  %v2247_v31 = vadd.f32 %v2246_v14, %v2192_v26 }
 0x5e2   :  { %v2250_v9 = vpop.f32.mrb[14].mxu0  ;;  %v2249_v53 = vadd.f32 %v2248_v18, %v2192_v26 }
 0x5e3   :  { %v2252_v22 = vpop.f32.mrb[15].mxu0  ;;  %v2251_v38 = vadd.f32 %v2250_v9, %v2197_v19  ;;  %v2339_v2 = vmax.f32 %v2247_v31, 0.0 }
 0x5e4   :  { %v2253_v29 = vadd.f32 %v2252_v22, %v2197_v19  ;;  %v2340_v45 = vmax.f32 %v2249_v53, 0.0 }
 0x5e5   :  { %v2344_v41 = vmax.f32 %v2251_v38, 0.0  ;;  %v3763_v5 = vmul.f32 %v2339_v2, %v2954_v1 }
 0x5e6   :  { %v2345_v47 = vmax.f32 %v2253_v29, 0.0  ;;  %v3766_v48 = vmul.f32 %v2340_v45, %v2956_v4 }
 0x5e7   :  { %v3769_v17 = vmul.f32 %v2344_v41, %v2954_v1  ;;  %v2373_v57 = vmul.f32 %v3763_v5, %v3763_v5 }
 0x5e8   :  { %v3772_v50 = vmul.f32 %v2345_v47, %v2956_v4  ;;  %v2359_v13 = vadd.f32 %v3766_v48, %v3763_v5  ;;  %v2374_v43 = vmul.f32 %v3766_v48, %v3766_v48 }
 0x5e9   :  { %v2378_v8 = vmul.f32 %v3769_v17, %v3769_v17 }
 0x5ea   :  { %v2379_v51 = vmul.f32 %v3772_v50, %v3772_v50  ;;  %v2365_v56 = vadd.f32 %v3772_v50, %v3769_v17  ;;  %v2383_v52 = vadd.f32 %v2374_v43, %v2373_v57 }
 0x5ec   :  { %v2389_v33 = vadd.f32 %v2379_v51, %v2378_v8  ;;  %v2398_v8 = vld [vmem:[%s3895_s11 + $0x8] sm:$0xff] }
 0x604   :  { %v2289_v23 = vpop.f32.mrb[16].mxu1 }
 0x605   :  { %v2290_v36 = vadd.f32 %v2289_v23, %v2192_v26  ;;  %v2291_v21 = vpop.f32.mrb[17].mxu1 }
 0x606   :  { %v2292_v32 = vadd.f32 %v2291_v21, %v2192_v26  ;;  %v2293_v11 = vpop.f32.mrb[18].mxu1 }
 0x607   :  { %v2341_v54 = vmax.f32 %v2290_v36, 0.0  ;;  %v2294_v63 = vadd.f32 %v2293_v11, %v2197_v19  ;;  %v2295_v34 = vpop.f32.mrb[19].mxu1 }
 0x608   :  { %v2342_v15 = vmax.f32 %v2292_v32, 0.0  ;;  %v2296_v6 = vadd.f32 %v2295_v34, %v2197_v19 }
 0x609   :  { %v3781_v55 = vmul.f32 %v2341_v54, %v2976_v25  ;;  %v2346_v61 = vmax.f32 %v2294_v63, 0.0 }
 0x60a   :  { %v2347_v39 = vmax.f32 %v2296_v6, 0.0  ;;  %v3789_v30 = vmul.f32 %v2342_v15, %v2980_v28 }
 0x60b   :  { %v2360_v58 = vadd.f32 %v2359_v13, %v3781_v55  ;;  %v3792_v42 = vmul.f32 %v2346_v61, %v2976_v25  ;;  %v2332_v59 = vpop.f32.mrb[16].mxu0  ;;  %v2375_v27 = vmul.f32 %v3781_v55, %v3781_v55  ;;  %v2397_v61 = vld [vmem:[%s3895_s11] sm:$0xff] }
 0x60c   :  { %v3797_v35 = vmul.f32 %v2347_v39, %v2980_v28  ;;  %v2333_v12 = vadd.f32 %v2332_v59, %v2192_v26  ;;  %v2334_v16 = vpop.f32.mrb[17].mxu0  ;;  %v2376_v24 = vmul.f32 %v3789_v30, %v3789_v30  ;;  %v2440_v59 = vld [vmem:[%s3896_s12 + $0x8] sm:$0xff] }
 0x60d   :  { %v2380_v20 = vmul.f32 %v3792_v42, %v3792_v42  ;;  %v2335_v46 = vpop.f32.mrb[18].mxu0  ;;  %v2366_v60 = vadd.f32 %v2365_v56, %v3792_v42  ;;  %v2361_v10 = vadd.f32 %v2360_v58, %v3789_v30  ;;  %v2384_v22 = vadd.f32 %v2383_v52, %v2375_v27  ;;  %v2439_v58 = vld [vmem:[%s3896_s12] sm:$0xff] }
 0x60e   :  { %v2343_v3 = vmax.f32 %v2333_v12, 0.0  ;;  %v2336_v62 = vadd.f32 %v2335_v46, %v2197_v19  ;;  %v2337_v49 = vpop.f32.mrb[19].mxu0  ;;  %v2381_v37 = vmul.f32 %v3797_v35, %v3797_v35 }
 0x60f   :  { %v2390_v7 = vadd.f32 %v2389_v33, %v2380_v20  ;;  %v2367_v9 = vadd.f32 %v2366_v60, %v3797_v35  ;;  %v2385_v29 = vadd.f32 %v2384_v22, %v2376_v24 }
 0x610   :  { %v3808_v44 = vmul.f32 %v2343_v3, %v2990_v40  ;;  %v2348_v0 = vmax.f32 %v2336_v62, 0.0 }
 0x611   :  { %v2391_v31 = vadd.f32 %v2390_v7, %v2381_v37 }
 0x612   :  { %v3813_v14 = vmul.f32 %v2348_v0, %v2990_v40  ;;  %v2362_v18 = vadd.f32 %v2361_v10, %v3808_v44  ;;  %v2377_v53 = vmul.f32 %v3808_v44, %v3808_v44 }
 0x614   :  { %2363 = vadd.xlane.f32.xlu1 %v2362_v18  ;;  %v2368_v26 = vadd.f32 %v2367_v9, %v3813_v14  ;;  %v2382_v19 = vmul.f32 %v3813_v14, %v3813_v14  ;;  %v2386_v2 = vadd.f32 %v2385_v29, %v2377_v53 }
 0x616   :  { %2369 = vadd.xlane.f32.xlu0 %v2368_v26  ;;  %v2392_v38 = vadd.f32 %v2391_v31, %v2382_v19 }
 0x618   :  { %2393 = vadd.xlane.f32.xlu1 %v2392_v38 }
 0x61a   :  { %2387 = vadd.xlane.f32.xlu0 %v2386_v2 }
 0x6a1   :  { %v2364_v45 = vpop.xlane.xlu1 %2363 }
 0x6a2   :  { %v2371_v47 = vmul.f32 0.001953125, %v2364_v45 }
 0x6a3   :  { %v2370_v41 = vpop.xlane.xlu0 %2369 }
 0x6a4   :  { %v2372_v23 = vmul.f32 0.001953125, %v2370_v41  ;;  %v2399_v34 = vmul.f32 %v2371_v47, %v2371_v47  ;;  %v2409_v12 = vsub.f32 %v3763_v5, %v2371_v47  ;;  %v2410_v16 = vsub.f32 %v3766_v48, %v2371_v47 }
 0x6a5   :  { %v2394_v36 = vpop.xlane.xlu1 %2393  ;;  %v2411_v33 = vsub.f32 %v3781_v55, %v2371_v47  ;;  %v2412_v20 = vsub.f32 %v3789_v30, %v2371_v47  ;;  %v2413_v46 = vsub.f32 %v3808_v44, %v2371_v47 }
 0x6a6   :  { %v2400_v21 = vmul.f32 %v2372_v23, %v2372_v23  ;;  %v2396_v32 = vmul.f32 0.001953125, %v2394_v36  ;;  %v2414_v60 = vsub.f32 %v3769_v17, %v2372_v23  ;;  %v2415_v3 = vsub.f32 %v3772_v50, %v2372_v23 }
 0x6a7   :  { %v2388_v11 = vpop.xlane.xlu0 %2387  ;;  %v2416_v62 = vsub.f32 %v3792_v42, %v2372_v23  ;;  %v2417_v49 = vsub.f32 %v3797_v35, %v2372_v23  ;;  %v2418_v55 = vsub.f32 %v3813_v14, %v2372_v23 }
 0x6a8   :  { %v2402_v54 = vsub.f32 %v2396_v32, %v2400_v21  ;;  %v2395_v63 = vmul.f32 0.001953125, %v2388_v11 }
 0x6aa   :  { %v2404_v13 = vadd.f32 1e-05, %v2402_v54  ;;  %v2401_v15 = vsub.f32 %v2395_v63, %v2399_v34 }
 0x6ac   :  { %2702 = vrsqrt.f32 %v2404_v13  ;;  %v2403_v6 = vadd.f32 1e-05, %v2401_v15 }
 0x6ae   :  { %2704 = vrsqrt.f32 %v2403_v6 }
 0x6b6   :  { %v2703_v51 = vpop.eup %2702 }
 0x6b7   :  { %v2408_v57 = vmul.f32 %v2703_v51, %v2398_v8 }
 0x6b8   :  { %v2705_v39 = vpop.eup %2704 }
 0x6b9   :  { %2426 = vperm.xlu1 %2654, %v2408_v57   ;;  %v2407_v43 = vmul.f32 %v2705_v39, %v2397_v61 }
 0x6bb   :  { %2421 = vperm.xlu0 %2653, %v2407_v43  }
 0x6bd   :  { %2443 = vperm.xlu1 %2654, %v2439_v58  }
 0x6bf   :  { %2448 = vperm.xlu0 %2653, %v2440_v59  }
 0x738   :  { %v2427_v56 = vpop.permute.xlu1 %2426 }
 0x739   :  { %v2434_v30 = vmul.f32 %v2427_v56, %v2414_v60  ;;  %v2435_v7 = vmul.f32 %v2427_v56, %v2415_v3  ;;  %v2436_v22 = vmul.f32 %v2427_v56, %v2416_v62  ;;  %v2437_v42 = vmul.f32 %v2427_v56, %v2417_v49 }
 0x73a   :  { %v2422_v27 = vpop.permute.xlu0 %2421  ;;  %v2438_v26 = vmul.f32 %v2427_v56, %v2418_v55 }
 0x73b   :  { %v2429_v52 = vmul.f32 %v2422_v27, %v2409_v12  ;;  %v2430_v10 = vmul.f32 %v2422_v27, %v2410_v16  ;;  %v2431_v5 = vmul.f32 %v2422_v27, %v2411_v33  ;;  %v2432_v37 = vmul.f32 %v2422_v27, %v2412_v20 }
 0x73c   :  { %v2433_v48 = vmul.f32 %v2422_v27, %v2413_v46  ;;  %v2444_v0 = vpop.permute.xlu1 %2443 }
 0x73d   :  { %v2451_v44 = vadd.f32 %v2444_v0, %v2429_v52  ;;  %v2452_v24 = vadd.f32 %v2444_v0, %v2430_v10  ;;  %v2453_v18 = vadd.f32 %v2444_v0, %v2431_v5  ;;  %v2454_v17 = vadd.f32 %v2444_v0, %v2432_v37 }
 0x73e   :  { %v2455_v9 = vadd.f32 %v2444_v0, %v2433_v48  ;;  %v2449_v50 = vpop.permute.xlu0 %2448 }
 0x73f   :  { %v2461_v35 = vmul.f32 %v2451_v44, %v2954_v1  ;;  %v2462_v19 = vmul.f32 %v2452_v24, %v2956_v4  ;;  %v2463_v31 = vmul.f32 %v2453_v18, %v2976_v25  ;;  %v2464_v53 = vmul.f32 %v2454_v17, %v2980_v28 }
 0x740   :  { %v2465_v14 = vmul.f32 %v2455_v9, %v2990_v40  ;;  %v2456_v38 = vadd.f32 %v2449_v50, %v2434_v30  ;;  %v2457_v29 = vadd.f32 %v2449_v50, %v2435_v7  ;;  %v2458_v2 = vadd.f32 %v2449_v50, %v2436_v22 }
 0x741   :  { %2471 = vst [vmem:[%s3897_s13] sm:$0xff] %v2461_v35  ;;  %2472 = vst [vmem:[%s3897_s13 + $0x8] sm:$0xff] %v2462_v19  ;;  %v2459_v45 = vadd.f32 %v2449_v50, %v2437_v42  ;;  %v2460_v41 = vadd.f32 %v2449_v50, %v2438_v26 }
 0x742   :  { %2473 = vst [vmem:[%s3897_s13 + $0x10] sm:$0xff] %v2463_v31  ;;  %2474 = vst [vmem:[%s3897_s13 + $0x18] sm:$0xff] %v2464_v53  ;;  %v2466_v47 = vmul.f32 %v2456_v38, %v2954_v1  ;;  %v2467_v23 = vmul.f32 %v2457_v29, %v2956_v4  ;;  %v2468_v36 = vmul.f32 %v2458_v2, %v2976_v25 }
 0x743   :  { %2475 = vst [vmem:[%s3897_s13 + $0x20] sm:$0xff] %v2465_v14  ;;  %v2469_v21 = vmul.f32 %v2459_v45, %v2980_v28  ;;  %v2470_v32 = vmul.f32 %v2460_v41, %v2990_v40 }
 0x744   :  { %2476 = vst [vmem:[%s3897_s13 + $0x28] sm:$0xff] %v2466_v47  ;;  %2477 = vst [vmem:[%s3897_s13 + $0x30] sm:$0xff] %v2467_v23 }
 0x745   :  { %2478 = vst [vmem:[%s3897_s13 + $0x38] sm:$0xff] %v2468_v36  ;;  %2479 = vst [vmem:[%s3897_s13 + $0x40] sm:$0xff] %v2469_v21 }
 0x746   :  { %2480 = vst [vmem:[%s3897_s13 + $0x48] sm:$0xff] %v2470_v32 }

</bundles_post_ra>
